<compile_context>
chip_gen: v5e
topology: v5e:2x2
jax: 0.10.0
libtpu: 0.0.40
codegen_flags: <defaults>
</compile_context>

<pallas_src>
import functools

import jax
import jax.numpy as jnp
import numpy as np
from jax.experimental import pallas as pl
from jax.experimental.pallas import tpu as pltpu

_BN_EPS = 1e-5


# ---------------------------------------------------------------------------
# In-kernel helpers
# ---------------------------------------------------------------------------
def _conv3x3(h, w_ref, s_ref, xmasks, W, pad):
    """3x3 conv (padding=1) as one im2col matmul, channels-major.

    h:      (C, H*W) float32 activation.
    w_ref:  (Cout, 9*C) bf16 weight, tap-major ((ky*3+kx)*C + ci), BN-scale folded.
    s_ref:  (Cout, 1) f32 per-channel shift (conv bias + BN folded).
    xmasks: per-kx column-boundary masks, shape (1, H*W) bool (kx=1 is None).
    Returns (Cout, H*W) float32.
    """
    C, HW = h.shape
    hb = h.astype(jnp.bfloat16)
    zpad = jnp.zeros((C, pad), dtype=jnp.bfloat16)
    # Zero-pad the flattened spatial axis with lane-aligned blocks; the vertical
    # (row) out-of-bounds taps land in this padding, horizontal ones are masked.
    hp = jnp.concatenate([zpad, hb, zpad], axis=1)          # (C, HW + 2*pad)

    taps = []
    for ky in range(3):
        for kx in range(3):
            off = (ky - 1) * W + (kx - 1)
            s = pad + off
            t = jax.lax.slice(hp, (0, s), (C, s + HW))      # shifted copy (C, HW)
            m = xmasks[kx]
            if m is not None:
                t = jnp.where(m, t, jnp.bfloat16(0))
            taps.append(t)
    slab = jnp.concatenate(taps, axis=0)                    # (9*C, HW) bf16

    acc = jnp.dot(w_ref[...], slab, preferred_element_type=jnp.float32)
    return acc + s_ref[...]


def _resblk_kernel(x_ref,      # (1, Cin, H*W)  bf16
                   w1_ref,     # (C1, Cin)      bf16   1x1 conv (BN scale folded)
                   s1_ref,     # (C1, 1)        f32    shift
                   w2_ref,     # (C2, 9*C1)     bf16   3x3 conv (im2col, folded)
                   s2_ref,     # (C2, 1)        f32
                   w3_ref,     # (C3, 9*C2)     bf16
                   s3_ref,     # (C3, 1)        f32
                   ws_ref,     # (C3, Cin)      bf16   shortcut 1x1 conv
                   ss_ref,     # (C3, 1)        f32
                   o_ref,      # (1, C3, H*W)   f32
                   *, H, W):
    HW = H * W
    pad = ((W + 1) + 127) // 128 * 128        # lane-aligned zero padding >= W+1

    x = x_ref[0]                              # (Cin, HW) bf16

    # Horizontal border masks (one per kx tap); vertical borders are handled by
    # the zero padding of the flattened spatial axis.  Computed once, reused.
    col = jax.lax.broadcasted_iota(jnp.int32, (1, HW), 1) % W
    xmasks = (col >= 1, None, col <= W - 2)

    # ---- layer 1: 1x1 conv + BN (folded) + ReLU ---------------------------
    h1 = jnp.dot(w1_ref[...], x, preferred_element_type=jnp.float32)
    h1 = jnp.maximum(h1 + s1_ref[...], 0.0)                  # (C1, HW) f32

    # ---- layer 2: 3x3 conv + BN (folded) + ReLU ---------------------------
    h2 = jnp.maximum(_conv3x3(h1, w2_ref, s2_ref, xmasks, W, pad), 0.0)

    # ---- layer 3: 3x3 conv + BN (folded), no ReLU -------------------------
    net = _conv3x3(h2, w3_ref, s3_ref, xmasks, W, pad)       # (C3, HW) f32

    # ---- shortcut: 1x1 conv + BN (folded) ---------------------------------
    sc = jnp.dot(ws_ref[...], x, preferred_element_type=jnp.float32) + ss_ref[...]

    # ---- residual add + final ReLU ----------------------------------------
    o_ref[0] = jnp.maximum(net + sc, 0.0).astype(o_ref.dtype)


# ---------------------------------------------------------------------------
# Wrapper: parameter folding (BN + bias into weights/shift) + pallas_call
# ---------------------------------------------------------------------------
def _fold_conv_bn(w_oihw, bias, gamma, beta, mean, var):
    """Fold conv bias + eval-mode BatchNorm into the conv weight and a shift.

    Returns:
      w_im:  (O, KH*KW*I) bf16, tap-major columns ((ky*KW+kx)*I + ci), scaled by
             the BN scale per output channel.
      shift: (O, 1) f32,  beta - mean*scale + bias*scale.
    """
    O, I, KH, KW = w_oihw.shape
    scale = gamma / jnp.sqrt(var + _BN_EPS)                      # (O,)
    shift = beta - mean * scale + bias * scale                   # (O,)
    w_im = jnp.transpose(w_oihw, (0, 2, 3, 1)).reshape(O, KH * KW * I)
    w_im = w_im * scale[:, None]
    return w_im.astype(jnp.bfloat16), shift[:, None].astype(jnp.float32)


def resblk_forward(x_nchw, params):
    """x_nchw: (N, Cin, H, W) float32. Returns (N, C3, H, W) float32."""
    N, Cin, H, W = x_nchw.shape
    HW = H * W

    # Channels-major, lane-dense spatial axis; NCHW needs only a reshape.
    x = x_nchw.reshape(N, Cin, HW).astype(jnp.bfloat16)

    w1, s1 = _fold_conv_bn(params['w1'], params['b1'], *params['bn1'])
    w2, s2 = _fold_conv_bn(params['w2'], params['b2'], *params['bn2'])
    w3, s3 = _fold_conv_bn(params['w3'], params['b3'], *params['bn3'])
    ws, ss = _fold_conv_bn(params['ws'], params['bs'], *params['bns'])
    C3 = w3.shape[0]

    def wspec(shape):
        return pl.BlockSpec(shape, lambda n, _nd=len(shape): (0,) * _nd)

    out = pl.pallas_call(
        functools.partial(_resblk_kernel, H=H, W=W),
        out_shape=jax.ShapeDtypeStruct((N, C3, HW), jnp.float32),
        grid=(N,),
        in_specs=[
            pl.BlockSpec((1, Cin, HW), lambda n: (n, 0, 0)),
            wspec(w1.shape), wspec(s1.shape),
            wspec(w2.shape), wspec(s2.shape),
            wspec(w3.shape), wspec(s3.shape),
            wspec(ws.shape), wspec(ss.shape),
        ],
        out_specs=pl.BlockSpec((1, C3, HW), lambda n: (n, 0, 0)),
        compiler_params=pltpu.CompilerParams(
            dimension_semantics=("parallel",),          # megacore batch sharding
            vmem_limit_bytes=32 * 1024 * 1024),
    )(x, w1, s1, w2, s2, w3, s3, ws, ss)

    return out.reshape(N, C3, H, W)                      # already NCHW


# ---------------------------------------------------------------------------
# Pure-JAX reference (NCHW, lax.conv, f32) for correctness checking.
# ---------------------------------------------------------------------------
def _conv_ref(x, w, b, pad):
    y = jax.lax.conv_general_dilated(
        x, w, window_strides=(1, 1), padding=[(pad, pad), (pad, pad)],
        dimension_numbers=('NCHW', 'OIHW', 'NCHW'))
    return y + b[None, :, None, None]


def _bn_ref(x, gamma, beta, mean, var):
    s = gamma / jnp.sqrt(var + _BN_EPS)
    return x * s[None, :, None, None] + (beta - mean * s)[None, :, None, None]


def resblk_reference(x, p):
    h = jax.nn.relu(_bn_ref(_conv_ref(x, p['w1'], p['b1'], 0), *p['bn1']))
    h = jax.nn.relu(_bn_ref(_conv_ref(h, p['w2'], p['b2'], 1), *p['bn2']))
    h = _bn_ref(_conv_ref(h, p['w3'], p['b3'], 1), *p['bn3'])
    sc = _bn_ref(_conv_ref(x, p['ws'], p['bs'], 0), *p['bns'])
    return jax.nn.relu(h + sc)


# ---------------------------------------------------------------------------
def _make_params(key, cin, c1, c2, c3):
    ks = jax.random.split(key, 16)
    def w(k, shape, fan_in):
        return (jax.random.normal(k, shape, jnp.float32) / np.sqrt(fan_in)).astype(jnp.float32)
    def bn(k, c):
        k1, k2, k3, k4 = jax.random.split(k, 4)
        gamma = 1.0 + 0.1 * jax.random.normal(k1, (c,), jnp.float32)
        beta = 0.1 * jax.random.normal(k2, (c,), jnp.float32)
        mean = 0.1 * jax.random.normal(k3, (c,), jnp.float32)
        var = jax.random.uniform(k4, (c,), jnp.float32, 0.5, 1.5)
        return (gamma, beta, mean, var)
    return dict(
        w1=w(ks[0], (c1, cin, 1, 1), cin), b1=0.1 * jax.random.normal(ks[1], (c1,), jnp.float32),
        bn1=bn(ks[2], c1),
        w2=w(ks[3], (c2, c1, 3, 3), c1 * 9), b2=0.1 * jax.random.normal(ks[4], (c2,), jnp.float32),
        bn2=bn(ks[5], c2),
        w3=w(ks[6], (c3, c2, 3, 3), c2 * 9), b3=0.1 * jax.random.normal(ks[7], (c3,), jnp.float32),
        bn3=bn(ks[8], c3),
        ws=w(ks[9], (c3, cin, 1, 1), cin), bs=0.1 * jax.random.normal(ks[10], (c3,), jnp.float32),
        bns=bn(ks[11], c3),
    )


if __name__ == "__main__":
    key = jax.random.PRNGKey(0)
    kx, kp = jax.random.split(key)

    N, Cin, H, W = 2, 4, 16, 16          # input (NCHW)
    C = 32                               # chs = [4, 32, 32, 32]
    x = jax.random.normal(kx, (N, Cin, H, W), jnp.float32)
    params = _make_params(kp, Cin, C, C, C)

    out = jax.block_until_ready(resblk_forward(x, params))
    ref = jax.block_until_ready(resblk_reference(x, params))

    # bf16 MXU operands (f32 accumulation) vs. a pure-f32 reference: tolerance is
    # set in the bf16 regime; structural bugs (wrong tap/BN fold) are O(1) errors.
    np.testing.assert_allclose(np.asarray(out), np.asarray(ref), rtol=5e-2, atol=5e-2)

    print("KERNEL_OK")
</pallas_src>

<mosaic_0001>
module attributes {stable_mosaic.version = 11 : i64} {
  func.func @_resblk_kernel(%arg0: i32, %arg1: memref<1x4x256xbf16, #tpu.memory_space<vmem>>, %arg2: memref<32x4xbf16, #tpu.memory_space<vmem>>, %arg3: memref<32x1xf32, #tpu.memory_space<vmem>>, %arg4: memref<32x288xbf16, #tpu.memory_space<vmem>>, %arg5: memref<32x1xf32, #tpu.memory_space<vmem>>, %arg6: memref<32x288xbf16, #tpu.memory_space<vmem>>, %arg7: memref<32x1xf32, #tpu.memory_space<vmem>>, %arg8: memref<32x4xbf16, #tpu.memory_space<vmem>>, %arg9: memref<32x1xf32, #tpu.memory_space<vmem>>, %arg10: memref<1x32x256xf32, #tpu.memory_space<vmem>>) attributes {dimension_semantics = [#tpu.dimension_semantics<parallel>], iteration_bounds = array<i64: 2>, scalar_prefetch = 0 : i64, scratch_operands = 0 : i64, tpu.core_type = #tpu.core_type<tc>, window_params = [{transform_indices = @transform_0, window_bounds = array<i64: 1, 4, 256>}, {pipeline_mode = #tpu.pipeline_mode<synchronous>, transform_indices = @transform_1, window_bounds = array<i64: 32, 4>}, {pipeline_mode = #tpu.pipeline_mode<synchronous>, transform_indices = @transform_2, window_bounds = array<i64: 32, 1>}, {pipeline_mode = #tpu.pipeline_mode<synchronous>, transform_indices = @transform_3, window_bounds = array<i64: 32, 288>}, {pipeline_mode = #tpu.pipeline_mode<synchronous>, transform_indices = @transform_4, window_bounds = array<i64: 32, 1>}, {pipeline_mode = #tpu.pipeline_mode<synchronous>, transform_indices = @transform_5, window_bounds = array<i64: 32, 288>}, {pipeline_mode = #tpu.pipeline_mode<synchronous>, transform_indices = @transform_6, window_bounds = array<i64: 32, 1>}, {pipeline_mode = #tpu.pipeline_mode<synchronous>, transform_indices = @transform_7, window_bounds = array<i64: 32, 4>}, {pipeline_mode = #tpu.pipeline_mode<synchronous>, transform_indices = @transform_8, window_bounds = array<i64: 32, 1>}, {transform_indices = @transform_9, window_bounds = array<i64: 1, 32, 256>}]} {
    %c0 = arith.constant 0 : index
    %c0_0 = arith.constant 0 : index
    %c0_1 = arith.constant 0 : index
    %0 = vector.load %arg1[%c0, %c0_0, %c0_1] : memref<1x4x256xbf16, #tpu.memory_space<vmem>>, vector<1x4x256xbf16>
    %1 = vector.shape_cast %0 : vector<1x4x256xbf16> to vector<4x256xbf16>
    %2 = tpu.iota {dimensions = array<i32: 1>} : vector<1x256xi32>
    %c16_i32 = arith.constant 16 : i32
    %c0_i32 = arith.constant 0 : i32
    %3 = arith.cmpi eq, %c16_i32, %c0_i32 : i32
    %c1_i32 = arith.constant 1 : i32
    %4 = arith.select %3, %c1_i32, %c16_i32 : i32
    %5 = vector.broadcast %4 : i32 to vector<1x256xi32>
    %6 = arith.remsi %2, %5 : vector<1x256xi32>
    %c0_i32_2 = arith.constant 0 : i32
    %7 = vector.broadcast %c0_i32_2 : i32 to vector<1x256xi32>
    %8 = arith.cmpi ne, %6, %7 : vector<1x256xi32>
    %c0_i32_3 = arith.constant 0 : i32
    %9 = vector.broadcast %c0_i32_3 : i32 to vector<1x256xi32>
    %10 = arith.cmpi slt, %6, %9 : vector<1x256xi32>
    %c0_i32_4 = arith.constant 0 : i32
    %11 = arith.cmpi slt, %4, %c0_i32_4 : i32
    %12 = vector.broadcast %11 : i1 to vector<1x256xi1>
    %13 = vector.broadcast %12 : vector<1x256xi1> to vector<1x256xi1>
    %14 = arith.xori %10, %13 : vector<1x256xi1>
    %15 = arith.andi %14, %8 : vector<1x256xi1>
    %16 = vector.broadcast %4 : i32 to vector<1x256xi32>
    %17 = arith.addi %6, %16 : vector<1x256xi32>
    %18 = arith.select %15, %17, %6 : vector<1x256xi1>, vector<1x256xi32>
    %c1_i32_5 = arith.constant 1 : i32
    %19 = vector.broadcast %c1_i32_5 : i32 to vector<1x256xi32>
    %20 = arith.cmpi sge, %18, %19 : vector<1x256xi32>
    %c14_i32 = arith.constant 14 : i32
    %21 = vector.broadcast %c14_i32 : i32 to vector<1x256xi32>
    %22 = arith.cmpi sle, %18, %21 : vector<1x256xi32>
    %c0_6 = arith.constant 0 : index
    %c0_7 = arith.constant 0 : index
    %23 = vector.load %arg2[%c0_6, %c0_7] : memref<32x4xbf16, #tpu.memory_space<vmem>>, vector<32x4xbf16>
    %cst = arith.constant dense<0.000000e+00> : vector<32x256xf32>
    %24 = tpu.matmul %23, %1, %cst {dimension_numbers = #tpu.dot_dimension_numbers<[1], [0], [0], [1], [0, 0, 1, 1], [], []>} : vector<32x4xbf16>, vector<4x256xbf16>, vector<32x256xf32> -> vector<32x256xf32>
    %c0_8 = arith.constant 0 : index
    %c0_9 = arith.constant 0 : index
    %25 = vector.load %arg3[%c0_8, %c0_9] : memref<32x1xf32, #tpu.memory_space<vmem>>, vector<32x1xf32>
    %26 = vector.broadcast %25 : vector<32x1xf32> to vector<32x256xf32>
    %27 = arith.addf %24, %26 : vector<32x256xf32>
    %cst_10 = arith.constant 0.000000e+00 : f32
    %28 = vector.broadcast %cst_10 : f32 to vector<32x256xf32>
    %29 = arith.maximumf %27, %28 : vector<32x256xf32>
    %30 = arith.truncf %29 : vector<32x256xf32> to vector<32x256xbf16>
    %cst_11 = arith.constant 0.000000e+00 : bf16
    %31 = vector.broadcast %cst_11 : bf16 to vector<32x128xbf16>
    %32 = tpu.concatenate %31, %30, %31 in 1 : vector<32x128xbf16>, vector<32x256xbf16>, vector<32x128xbf16> -> vector<32x512xbf16>
    %33 = vector.extract_strided_slice %32 {offsets = [0, 111], sizes = [32, 256], strides = [1, 1]} : vector<32x512xbf16> to vector<32x256xbf16>
    %cst_12 = arith.constant 0.000000e+00 : bf16
    %34 = vector.shape_cast %20 : vector<1x256xi1> to vector<1x256xi1>
    %35 = vector.broadcast %34 : vector<1x256xi1> to vector<32x256xi1>
    %36 = vector.broadcast %cst_12 : bf16 to vector<32x256xbf16>
    %37 = arith.select %35, %33, %36 : vector<32x256xi1>, vector<32x256xbf16>
    %38 = vector.extract_strided_slice %32 {offsets = [0, 112], sizes = [32, 256], strides = [1, 1]} : vector<32x512xbf16> to vector<32x256xbf16>
    %39 = vector.extract_strided_slice %32 {offsets = [0, 113], sizes = [32, 256], strides = [1, 1]} : vector<32x512xbf16> to vector<32x256xbf16>
    %cst_13 = arith.constant 0.000000e+00 : bf16
    %40 = vector.shape_cast %22 : vector<1x256xi1> to vector<1x256xi1>
    %41 = vector.broadcast %40 : vector<1x256xi1> to vector<32x256xi1>
    %42 = vector.broadcast %cst_13 : bf16 to vector<32x256xbf16>
    %43 = arith.select %41, %39, %42 : vector<32x256xi1>, vector<32x256xbf16>
    %44 = vector.extract_strided_slice %32 {offsets = [0, 127], sizes = [32, 256], strides = [1, 1]} : vector<32x512xbf16> to vector<32x256xbf16>
    %cst_14 = arith.constant 0.000000e+00 : bf16
    %45 = vector.shape_cast %20 : vector<1x256xi1> to vector<1x256xi1>
    %46 = vector.broadcast %45 : vector<1x256xi1> to vector<32x256xi1>
    %47 = vector.broadcast %cst_14 : bf16 to vector<32x256xbf16>
    %48 = arith.select %46, %44, %47 : vector<32x256xi1>, vector<32x256xbf16>
    %49 = vector.extract_strided_slice %32 {offsets = [0, 128], sizes = [32, 256], strides = [1, 1]} : vector<32x512xbf16> to vector<32x256xbf16>
    %50 = vector.extract_strided_slice %32 {offsets = [0, 129], sizes = [32, 256], strides = [1, 1]} : vector<32x512xbf16> to vector<32x256xbf16>
    %cst_15 = arith.constant 0.000000e+00 : bf16
    %51 = vector.shape_cast %22 : vector<1x256xi1> to vector<1x256xi1>
    %52 = vector.broadcast %51 : vector<1x256xi1> to vector<32x256xi1>
    %53 = vector.broadcast %cst_15 : bf16 to vector<32x256xbf16>
    %54 = arith.select %52, %50, %53 : vector<32x256xi1>, vector<32x256xbf16>
    %55 = vector.extract_strided_slice %32 {offsets = [0, 143], sizes = [32, 256], strides = [1, 1]} : vector<32x512xbf16> to vector<32x256xbf16>
    %cst_16 = arith.constant 0.000000e+00 : bf16
    %56 = vector.shape_cast %20 : vector<1x256xi1> to vector<1x256xi1>
    %57 = vector.broadcast %56 : vector<1x256xi1> to vector<32x256xi1>
    %58 = vector.broadcast %cst_16 : bf16 to vector<32x256xbf16>
    %59 = arith.select %57, %55, %58 : vector<32x256xi1>, vector<32x256xbf16>
    %60 = vector.extract_strided_slice %32 {offsets = [0, 144], sizes = [32, 256], strides = [1, 1]} : vector<32x512xbf16> to vector<32x256xbf16>
    %61 = vector.extract_strided_slice %32 {offsets = [0, 145], sizes = [32, 256], strides = [1, 1]} : vector<32x512xbf16> to vector<32x256xbf16>
    %cst_17 = arith.constant 0.000000e+00 : bf16
    %62 = vector.shape_cast %22 : vector<1x256xi1> to vector<1x256xi1>
    %63 = vector.broadcast %62 : vector<1x256xi1> to vector<32x256xi1>
    %64 = vector.broadcast %cst_17 : bf16 to vector<32x256xbf16>
    %65 = arith.select %63, %61, %64 : vector<32x256xi1>, vector<32x256xbf16>
    %66 = tpu.concatenate %37, %38, %43, %48, %49, %54, %59, %60, %65 in 0 : vector<32x256xbf16>, vector<32x256xbf16>, vector<32x256xbf16>, vector<32x256xbf16>, vector<32x256xbf16>, vector<32x256xbf16>, vector<32x256xbf16>, vector<32x256xbf16>, vector<32x256xbf16> -> vector<288x256xbf16>
    %c0_18 = arith.constant 0 : index
    %c0_19 = arith.constant 0 : index
    %67 = vector.load %arg4[%c0_18, %c0_19] : memref<32x288xbf16, #tpu.memory_space<vmem>>, vector<32x288xbf16>
    %cst_20 = arith.constant dense<0.000000e+00> : vector<32x256xf32>
    %68 = tpu.matmul %67, %66, %cst_20 {dimension_numbers = #tpu.dot_dimension_numbers<[1], [0], [0], [1], [0, 0, 1, 1], [], []>} : vector<32x288xbf16>, vector<288x256xbf16>, vector<32x256xf32> -> vector<32x256xf32>
    %c0_21 = arith.constant 0 : index
    %c0_22 = arith.constant 0 : index
    %69 = vector.load %arg5[%c0_21, %c0_22] : memref<32x1xf32, #tpu.memory_space<vmem>>, vector<32x1xf32>
    %70 = vector.broadcast %69 : vector<32x1xf32> to vector<32x256xf32>
    %71 = arith.addf %68, %70 : vector<32x256xf32>
    %cst_23 = arith.constant 0.000000e+00 : f32
    %72 = vector.broadcast %cst_23 : f32 to vector<32x256xf32>
    %73 = arith.maximumf %71, %72 : vector<32x256xf32>
    %74 = arith.truncf %73 : vector<32x256xf32> to vector<32x256xbf16>
    %cst_24 = arith.constant 0.000000e+00 : bf16
    %75 = vector.broadcast %cst_24 : bf16 to vector<32x128xbf16>
    %76 = tpu.concatenate %75, %74, %75 in 1 : vector<32x128xbf16>, vector<32x256xbf16>, vector<32x128xbf16> -> vector<32x512xbf16>
    %77 = vector.extract_strided_slice %76 {offsets = [0, 111], sizes = [32, 256], strides = [1, 1]} : vector<32x512xbf16> to vector<32x256xbf16>
    %cst_25 = arith.constant 0.000000e+00 : bf16
    %78 = vector.shape_cast %20 : vector<1x256xi1> to vector<1x256xi1>
    %79 = vector.broadcast %78 : vector<1x256xi1> to vector<32x256xi1>
    %80 = vector.broadcast %cst_25 : bf16 to vector<32x256xbf16>
    %81 = arith.select %79, %77, %80 : vector<32x256xi1>, vector<32x256xbf16>
    %82 = vector.extract_strided_slice %76 {offsets = [0, 112], sizes = [32, 256], strides = [1, 1]} : vector<32x512xbf16> to vector<32x256xbf16>
    %83 = vector.extract_strided_slice %76 {offsets = [0, 113], sizes = [32, 256], strides = [1, 1]} : vector<32x512xbf16> to vector<32x256xbf16>
    %cst_26 = arith.constant 0.000000e+00 : bf16
    %84 = vector.shape_cast %22 : vector<1x256xi1> to vector<1x256xi1>
    %85 = vector.broadcast %84 : vector<1x256xi1> to vector<32x256xi1>
    %86 = vector.broadcast %cst_26 : bf16 to vector<32x256xbf16>
    %87 = arith.select %85, %83, %86 : vector<32x256xi1>, vector<32x256xbf16>
    %88 = vector.extract_strided_slice %76 {offsets = [0, 127], sizes = [32, 256], strides = [1, 1]} : vector<32x512xbf16> to vector<32x256xbf16>
    %cst_27 = arith.constant 0.000000e+00 : bf16
    %89 = vector.shape_cast %20 : vector<1x256xi1> to vector<1x256xi1>
    %90 = vector.broadcast %89 : vector<1x256xi1> to vector<32x256xi1>
    %91 = vector.broadcast %cst_27 : bf16 to vector<32x256xbf16>
    %92 = arith.select %90, %88, %91 : vector<32x256xi1>, vector<32x256xbf16>
    %93 = vector.extract_strided_slice %76 {offsets = [0, 128], sizes = [32, 256], strides = [1, 1]} : vector<32x512xbf16> to vector<32x256xbf16>
    %94 = vector.extract_strided_slice %76 {offsets = [0, 129], sizes = [32, 256], strides = [1, 1]} : vector<32x512xbf16> to vector<32x256xbf16>
    %cst_28 = arith.constant 0.000000e+00 : bf16
    %95 = vector.shape_cast %22 : vector<1x256xi1> to vector<1x256xi1>
    %96 = vector.broadcast %95 : vector<1x256xi1> to vector<32x256xi1>
    %97 = vector.broadcast %cst_28 : bf16 to vector<32x256xbf16>
    %98 = arith.select %96, %94, %97 : vector<32x256xi1>, vector<32x256xbf16>
    %99 = vector.extract_strided_slice %76 {offsets = [0, 143], sizes = [32, 256], strides = [1, 1]} : vector<32x512xbf16> to vector<32x256xbf16>
    %cst_29 = arith.constant 0.000000e+00 : bf16
    %100 = vector.shape_cast %20 : vector<1x256xi1> to vector<1x256xi1>
    %101 = vector.broadcast %100 : vector<1x256xi1> to vector<32x256xi1>
    %102 = vector.broadcast %cst_29 : bf16 to vector<32x256xbf16>
    %103 = arith.select %101, %99, %102 : vector<32x256xi1>, vector<32x256xbf16>
    %104 = vector.extract_strided_slice %76 {offsets = [0, 144], sizes = [32, 256], strides = [1, 1]} : vector<32x512xbf16> to vector<32x256xbf16>
    %105 = vector.extract_strided_slice %76 {offsets = [0, 145], sizes = [32, 256], strides = [1, 1]} : vector<32x512xbf16> to vector<32x256xbf16>
    %cst_30 = arith.constant 0.000000e+00 : bf16
    %106 = vector.shape_cast %22 : vector<1x256xi1> to vector<1x256xi1>
    %107 = vector.broadcast %106 : vector<1x256xi1> to vector<32x256xi1>
    %108 = vector.broadcast %cst_30 : bf16 to vector<32x256xbf16>
    %109 = arith.select %107, %105, %108 : vector<32x256xi1>, vector<32x256xbf16>
    %110 = tpu.concatenate %81, %82, %87, %92, %93, %98, %103, %104, %109 in 0 : vector<32x256xbf16>, vector<32x256xbf16>, vector<32x256xbf16>, vector<32x256xbf16>, vector<32x256xbf16>, vector<32x256xbf16>, vector<32x256xbf16>, vector<32x256xbf16>, vector<32x256xbf16> -> vector<288x256xbf16>
    %c0_31 = arith.constant 0 : index
    %c0_32 = arith.constant 0 : index
    %111 = vector.load %arg6[%c0_31, %c0_32] : memref<32x288xbf16, #tpu.memory_space<vmem>>, vector<32x288xbf16>
    %cst_33 = arith.constant dense<0.000000e+00> : vector<32x256xf32>
    %112 = tpu.matmul %111, %110, %cst_33 {dimension_numbers = #tpu.dot_dimension_numbers<[1], [0], [0], [1], [0, 0, 1, 1], [], []>} : vector<32x288xbf16>, vector<288x256xbf16>, vector<32x256xf32> -> vector<32x256xf32>
    %c0_34 = arith.constant 0 : index
    %c0_35 = arith.constant 0 : index
    %113 = vector.load %arg7[%c0_34, %c0_35] : memref<32x1xf32, #tpu.memory_space<vmem>>, vector<32x1xf32>
    %114 = vector.broadcast %113 : vector<32x1xf32> to vector<32x256xf32>
    %115 = arith.addf %112, %114 : vector<32x256xf32>
    %c0_36 = arith.constant 0 : index
    %c0_37 = arith.constant 0 : index
    %116 = vector.load %arg8[%c0_36, %c0_37] : memref<32x4xbf16, #tpu.memory_space<vmem>>, vector<32x4xbf16>
    %cst_38 = arith.constant dense<0.000000e+00> : vector<32x256xf32>
    %117 = tpu.matmul %116, %1, %cst_38 {dimension_numbers = #tpu.dot_dimension_numbers<[1], [0], [0], [1], [0, 0, 1, 1], [], []>} : vector<32x4xbf16>, vector<4x256xbf16>, vector<32x256xf32> -> vector<32x256xf32>
    %c0_39 = arith.constant 0 : index
    %c0_40 = arith.constant 0 : index
    %118 = vector.load %arg9[%c0_39, %c0_40] : memref<32x1xf32, #tpu.memory_space<vmem>>, vector<32x1xf32>
    %119 = vector.broadcast %118 : vector<32x1xf32> to vector<32x256xf32>
    %120 = arith.addf %117, %119 : vector<32x256xf32>
    %121 = arith.addf %115, %120 : vector<32x256xf32>
    %cst_41 = arith.constant 0.000000e+00 : f32
    %122 = vector.broadcast %cst_41 : f32 to vector<32x256xf32>
    %123 = arith.maximumf %121, %122 : vector<32x256xf32>
    %c0_42 = arith.constant 0 : index
    %c0_43 = arith.constant 0 : index
    %c0_44 = arith.constant 0 : index
    %124 = vector.load %arg10[%c0_42, %c0_43, %c0_44] : memref<1x32x256xf32, #tpu.memory_space<vmem>>, vector<1x32x256xf32>
    %125 = vector.shape_cast %124 : vector<1x32x256xf32> to vector<32x256xf32>
    %126 = vector.shape_cast %123 : vector<32x256xf32> to vector<1x32x256xf32>
    tpu.vector_store %arg10[%c0_42, %c0_43, %c0_44], %126 {strides = array<i32>} : memref<1x32x256xf32, #tpu.memory_space<vmem>>, vector<1x32x256xf32>,
    return
  }
  func.func @transform_0(%arg0: i32) -> (i32, i32, i32) {
    %c0_i32 = arith.constant 0 : i32
    %c0_i32_0 = arith.constant 0 : i32
    %c0_i32_1 = arith.constant 0 : i32
    return %arg0, %c0_i32, %c0_i32_0 : i32, i32, i32
  }
  func.func @transform_1(%arg0: i32) -> (i32, i32) {
    %c0_i32 = arith.constant 0 : i32
    %c0_i32_0 = arith.constant 0 : i32
    %c0_i32_1 = arith.constant 0 : i32
    return %c0_i32, %c0_i32_0 : i32, i32
  }
  func.func @transform_2(%arg0: i32) -> (i32, i32) {
    %c0_i32 = arith.constant 0 : i32
    %c0_i32_0 = arith.constant 0 : i32
    %c0_i32_1 = arith.constant 0 : i32
    return %c0_i32, %c0_i32_0 : i32, i32
  }
  func.func @transform_3(%arg0: i32) -> (i32, i32) {
    %c0_i32 = arith.constant 0 : i32
    %c0_i32_0 = arith.constant 0 : i32
    %c0_i32_1 = arith.constant 0 : i32
    return %c0_i32, %c0_i32_0 : i32, i32
  }
  func.func @transform_4(%arg0: i32) -> (i32, i32) {
    %c0_i32 = arith.constant 0 : i32
    %c0_i32_0 = arith.constant 0 : i32
    %c0_i32_1 = arith.constant 0 : i32
    return %c0_i32, %c0_i32_0 : i32, i32
  }
  func.func @transform_5(%arg0: i32) -> (i32, i32) {
    %c0_i32 = arith.constant 0 : i32
    %c0_i32_0 = arith.constant 0 : i32
    %c0_i32_1 = arith.constant 0 : i32
    return %c0_i32, %c0_i32_0 : i32, i32
  }
  func.func @transform_6(%arg0: i32) -> (i32, i32) {
    %c0_i32 = arith.constant 0 : i32
    %c0_i32_0 = arith.constant 0 : i32
    %c0_i32_1 = arith.constant 0 : i32
    return %c0_i32, %c0_i32_0 : i32, i32
  }
  func.func @transform_7(%arg0: i32) -> (i32, i32) {
    %c0_i32 = arith.constant 0 : i32
    %c0_i32_0 = arith.constant 0 : i32
    %c0_i32_1 = arith.constant 0 : i32
    return %c0_i32, %c0_i32_0 : i32, i32
  }
  func.func @transform_8(%arg0: i32) -> (i32, i32) {
    %c0_i32 = arith.constant 0 : i32
    %c0_i32_0 = arith.constant 0 : i32
    %c0_i32_1 = arith.constant 0 : i32
    return %c0_i32, %c0_i32_0 : i32, i32
  }
  func.func @transform_9(%arg0: i32) -> (i32, i32, i32) {
    %c0_i32 = arith.constant 0 : i32
    %c0_i32_0 = arith.constant 0 : i32
    %c0_i32_1 = arith.constant 0 : i32
    return %arg0, %c0_i32, %c0_i32_0 : i32, i32, i32
  }
}

</mosaic_0001>

<bundles_post_ra>
// kernel: tpu_custom_call.1
= control target key start
LH: loop header
LB: loop body
LE: loop exit
PB: predicated region body
PF: predicated region fallthrough
CT: control target
= control target key end

     0   :  { %14 = vsyncpa [#allocation3], 0  ;;  %s3320_s0 = inlined_call_operand.vmem [shape: bf16[2,4,256], index: 0, kind: input, shape index: {}]   ;;  %s3321_s1 = inlined_call_operand.vmem [shape: bf16[32,4], index: 1, kind: input, shape index: {}]   ;;  %s3322_s2 = inlined_call_operand.vmem [shape: f32[32,1], index: 2, kind: input, shape index: {}]   ;;  %s3323_s3 = inlined_call_operand.vmem [shape: bf16[32,288], index: 3, kind: input, shape index: {}]   ;;  %s3324_s4 = inlined_call_operand.vmem [shape: f32[32,1], index: 4, kind: input, shape index: {}]   ;;  %s3325_s5 = inlined_call_operand.vmem [shape: bf16[32,288], index: 5, kind: input, shape index: {}]   ;;  %s3326_s6 = inlined_call_operand.vmem [shape: f32[32,1], index: 6, kind: input, shape index: {}]   ;;  %s3327_s7 = inlined_call_operand.vmem [shape: bf16[32,4], index: 7, kind: input, shape index: {}]   ;;  %s3328_s8 = inlined_call_operand.vmem [shape: f32[32,1], index: 8, kind: input, shape index: {}]   ;;  %s3329_s9 = inlined_call_operand.hbm [shape: f32[2,32,256], index: 9, kind: output, shape index: {}]  }
   0x1   :  { %16 = vsyncpa [#allocation3 + $0x1], 0  ;;  %s2178_s30 = smov 0   ;;  %s2180_s10 = smov 0  }
   0x2   :  { %s2182_s11 = smov 0   ;;  %s2184_s12 = smov 0  }
   0x3 LB: > { %s2199_s13 = sadd.s32 4294967295, %s2111_s12   ;;  %s1873_s14 = sadd.s32 4294967294, %s2111_s12   ;;  %s2111_s12 = sphi %s2184_s12, %s3501_s12   ;;  %s2107_s11 = sphi %s2182_s11, %s3500_s11   ;;  %s2103_s10 = sphi %s2180_s10, %s3499_s10   ;;  %s2099_s30 = sphi %s2178_s30, %s3498_s30  }
   0x4   : > { %s2203_s15 = sadd.s32 1, %s2111_s12   ;;  %s223_s16 = sadd.s32 1, %s2107_s11 }
   0x5   : > { %s220_s17 = ssub.s32 %s2111_s12, %s2203_s15  ;;  %p233_p0 = scmp.ne.s32.totalorder %s2107_s11, %s2103_s10 }
   0x6   : > { %p221_p1 = scmp.eq.s32.totalorder %s220_s17, 0  ;;  %p234_p2 = scmp.eq.s32.totalorder %s2199_s13, 1 }
   0x7   : > { %p239_p3 = scmp.ne.s32.totalorder %s2103_s10, %s2099_s30  ;;  %p240_p4 = scmp.eq.s32.totalorder %s1873_s14, 1 }
   0x8   : > { %s2214_s18 = scalar_select %p221_p1, %s2107_s11, %s223_s16  }
   0x9   : > { %p2216_p5 = por %p234_p2, %p233_p0  ;;  %p2220_p6 = por %p240_p4, %p239_p3 }
   0xa   : > { %p1876_p7 = scmp.ge.s32.totalorder %s2111_s12, 1  ;;  %p290_p8 = scmp.lt.s32.totalorder %s2111_s12, 3 }
   0xc   : > { %p291_p9 = pnand %p1876_p7, %p290_p8 }
   0xd   : > { %p326_p10 = scmp.lt.s32.totalorder (!%p291_p9), %s2199_s13, 1  ;;  %s2114_s22 = smov (!%p291_p9), 127  }
   0xe   : > { %294 = sbr.rel (%p291_p9) target bundleno = 1285 (0x505), region = 56  ;;  %s2117_s27 = smov (!%p291_p9), 15  }
   0xf   : > { %s2118_s14 = smov (!%p291_p9), 17   ;;  %s2119_s16 = smov (!%p291_p9), 112  }
  0x10   : > { %s2120_s17 = smov (!%p291_p9), 111   ;;  %s2121_s21 = smov (!%p291_p9), 126  }
  0x11   : > { %s3346_s23 = smov (!%p291_p9), 96   ;;  %s3344_s24 = smov (!%p291_p9), 110  }
  0x12   : > { %s3426_s28 = smov (!%p291_p9), 94  }
  0x13   : > { %v370_v0 = vld [vmem:[%s3322_s2] sm:$0xff]  ;;  %v372_v1 = vld [vmem:[%s3322_s2 + $0x10] sm:$0xff]  ;;  %v335_v2 = vlaneseq  ;;  %v2113_v3 = vmov 0   ;;  %s327_s25 = scalar_select %p326_p10, %s2199_s13, 1  ;;  %v371_v9 = vld [vmem:[%s3322_s2 + $0x8] sm:$0xff]  ;;  %vm3331_vm6 = vcmask 1041408  }
  0x14   : > { %2047 = vset.pattern.permute.xlu1 %v2113_v3  ;;  %2046 = vset.pattern.permute.xlu0 %v2113_v3  ;;  %v373_v10 = vld [vmem:[%s3322_s2 + $0x18] sm:$0xff]  ;;  %v1966_v19 = vld [vmem:[%s3321_s1] sm:$0xff]  ;;  %vm3330_vm7 = vcmask 31744   ;;  %v1967_v22 = vld [vmem:[%s3321_s1 + $0x8] sm:$0xff]  ;;  %v2299_v40 = vunpack.c.l.b16 %v2113_v3  ;;  %v2302_v41 = vunpack.c.h.b16 %v2113_v3  ;;  %vm3334_vm8 = vcmask 1039360  }
  0x15   : > { %376 = vperm.xlu1 %2047, %v370_v0   ;;  %386 = vperm.xlu0 %2046, %v372_v1   ;;  %v336_v4 = vand.u32 127, %v335_v2  ;;  %s1965_s26 = sshll.u32 %s327_s25, 2  ;;  %s2115_s25 = smov 113   ;;  %v3353_v54 = vmov 0  ;;  %vm534_vm12 = vcmask 924672  }
  0x16   : > { %2048 = vset.pattern.permute.xlu2 %v2113_v3  ;;  %s330_s29 = scalar_lea.vmem %s3320_s0, %s1965_s26  ;;  %s2116_s26 = smov 1  }
  0x17   : > { %v337_v5 = vadd.s32 128, %v336_v4  ;;  %v342_v6 = vand.u32 15, %v336_v4  ;;  %v334_v7 = vld [vmem:[%s330_s29] sm:$0xf] }
  0x18   : > { %405 = vst [vmem:[#allocation1] ss:$4 sm:$0xff] %v334_v7 }
  0x19   : > { %v349_v8 = vand.u32 15, %v337_v5  ;;  %vm364_vm0 = vcmp.le.s32.totalorder %v342_v6, 14  ;;  %vm362_vm1 = vcmp.ge.s32.totalorder %v342_v6, 1 }
  0x1b   : > { %vm365_vm2 = vcmp.le.s32.totalorder %v349_v8, 14  ;;  %vm363_vm3 = vcmp.ge.s32.totalorder %v349_v8, 1 }
  0x1c   : > { %vm526_vm4 = vmpackc.low %vm365_vm2, %vm364_vm0  ;;  %vm606_vm0 = vcmask 121856  }
  0x1d   : > { %381 = vperm.xlu1 %2047, %v371_v9   ;;  %v527_v11 = vsel %vm526_vm4, 65537, %v2113_v3  ;;  %vm494_vm5 = vmpackc.low %vm363_vm3, %vm362_vm1  ;;  %391 = vperm.xlu0 %2046, %v373_v10  }
  0x1e   : > { %v495_v12 = vsel %vm494_vm5, 65537, %v2113_v3  ;;  %v529_v14 = vperm.slane %v527_v11, 4  ;;  %v528_v20 = vperm.slane %v527_v11, 0 }
  0x1f   : > { %v496_v13 = vperm.slane %v495_v12, 0  ;;  %v406_v15 = vld.sshfl [vmem:[#allocation1] sm:$0xff pattern:$0x73625140]  ;;  %v497_v21 = vperm.slane %v495_v12, 4 }
  0x20   : > { %v407_v16 = vld.sshfl [vmem:[#allocation1 + $0x8] sm:$0xff pattern:$0x73625140]  ;;  %v416_v17 = vsel %vm3331_vm6, %v406_v15, 0 }
  0x21   : > { %554 = vrot.lane.b32.xlu2 %v496_v13, %s2114_s22  ;;  %v418_v18 = vsel %vm3331_vm6, %v407_v16, 0  ;;  %1720 = vst [vmem:[#allocation1] ss:$4 sm:$0xff] %v334_v7  ;;  %427 = vmatpush.bf16.msra.mxu0 %v416_v17 }
  0x22   : > { %446 = vmatpush.bf16.msra.mxu1 %v418_v18 }
  0x24   : > { %1888 = vmatmul.msk.bf16.vlgmr.msra.gmra.mxu0 %vm3330_vm7, %v1966_v19 }
  0x25   : > { %532 = vrot.lane.b32.xlu1 %v529_v14, %s2115_s25  ;;  %530 = vrot.lane.b32.xlu0 %v528_v20, %s2115_s25  ;;  %s2124_s25 = smov 95  }
  0x26   : > { %1890 = vmatmul.msk.bf16.vlgmr.msra.gmra.mxu1 %vm3330_vm7, %v1966_v19 }
  0x29   : > { %556 = vrot.lane.b32.xlu2 %v497_v21, %s2114_s22 }
  0x2d   : > { %578 = vrot.lane.b32.xlu1 %v528_v20, %s2116_s26  ;;  %604 = vrot.lane.b32.xlu0 %v497_v21, %s2117_s27 }
  0x31   : > { %602 = vrot.lane.b32.xlu2 %v496_v13, %s2117_s27  ;;  %s3425_s27 = smov 110  }
  0x34   : > { %1889 = vmatmul.msk.bf16.gmra.mxu0 %vm3330_vm7, %v1967_v22 }
  0x35   : > { %626 = vrot.lane.b32.xlu1 %v528_v20, %s2118_s14  ;;  %688 = vrot.lane.b32.xlu0 %v2113_v3, %s2119_s16 }
  0x36   : > { %1891 = vmatmul.msk.bf16.gmra.mxu1 %vm3330_vm7, %v1967_v22  ;;  %vm582_vm7 = vcmask 7168  }
  0x39   : > { %580 = vrot.lane.b32.xlu2 %v529_v14, %s2116_s26  ;;  %s3342_s26 = smov 94  }
  0x3d   : > { %498 = vrot.lane.b32.xlu1 %v496_v13, %s2120_s17  ;;  %669 = vrot.lane.b32.xlu0 %v2113_v3, %s2121_s21 }
  0x41   : > { %628 = vrot.lane.b32.xlu2 %v529_v14, %s2118_s14 }
  0x45   : > { %740 = vrot.lane.b32.xlu0 %v2113_v3, %s3346_s23  ;;  %851 = vrot.lane.b32.xlu1 %v2113_v3, %s2118_s14 }
  0x49   : > { %651 = vrot.lane.b32.xlu2 %v2113_v3, %s2114_s22 }
  0x4d   : > { %721 = vrot.lane.b32.xlu0 %v2113_v3, %s3344_s24 }
  0x51   : > { %500 = vrot.lane.b32.xlu2 %v497_v21, %s2120_s17 }
  0x59   : > { %755 = vrot.lane.b32.xlu2 %v2113_v3, %s2124_s25 }
  0x61   : > { %774 = vrot.lane.b32.xlu2 %v2113_v3, %s3342_s26 }
  0x7b   : > { %v555_v23 = vpop.permute.xlu2 %554 }
  0x83   : > { %v2282_v24 = vpop.permute.xlu2 %556 }
  0x84   : > { %v559_v52 = vsel %vm3334_vm8, %v555_v23, %v2282_v24  ;;  %v567_v2 = vunpack.c.l.b16 %v2282_v24  ;;  %v568_v3 = vunpack.c.h.b16 %v2282_v24 }
  0x85   : > { %v560_v60 = vunpack.c.l.b16 %v559_v52  ;;  %v561_v61 = vunpack.c.h.b16 %v559_v52 }
  0x86   : > { %vm571_vm1 = vcmp.ne.s32.totalorder %v567_v2, %v2299_v40  ;;  %vm572_vm2 = vcmp.ne.s32.totalorder %v568_v3, %v2302_v41 }
  0x87   : > { %v377_v26 = vpop.permute.xlu1 %376  ;;  %v2290_v30 = vpop.permute.xlu0 %386  ;;  %vm564_vm13 = vcmp.ne.s32.totalorder %v560_v60, %v2299_v40  ;;  %vm565_vm14 = vcmp.ne.s32.totalorder %v561_v61, %v2302_v41  ;;  %vm2352_vm5 = vmpackc.low %vm572_vm2, %vm571_vm1 }
  0x88   : > { %vm2333_vm15 = vmpackc.low %vm565_vm14, %vm564_vm13 }
  0x8b   : > { %v2284_v25 = vpop.permute.xlu2 %602 }
  0x8f   : > { %v382_v29 = vpop.permute.xlu1 %381  ;;  %v2296_v37 = vpop.permute.xlu0 %391 }
  0x93   : > { %v2286_v27 = vpop.permute.xlu2 %580 }
  0x97   : > { %v2294_v36 = vpop.permute.xlu1 %532  ;;  %v531_v62 = vpop.permute.xlu0 %530 }
  0x98   : > { %v535_v1 = vsel %vm534_vm12, %v531_v62, %v2294_v36  ;;  %v543_v14 = vunpack.c.l.b16 %v2294_v36  ;;  %v544_v15 = vunpack.c.h.b16 %v2294_v36  ;;  %vm3333_vm12 = vcmask 908288  }
  0x99   : > { %v536_v6 = vunpack.c.l.b16 %v535_v1  ;;  %v537_v7 = vunpack.c.h.b16 %v535_v1 }
  0x9a   : > { %vm547_vm13 = vcmp.ne.s32.totalorder %v543_v14, %v2299_v40  ;;  %vm548_vm14 = vcmp.ne.s32.totalorder %v544_v15, %v2302_v41 }
  0x9b   : > { %v2288_v28 = vpop.permute.xlu2 %628  ;;  %vm540_vm3 = vcmp.ne.s32.totalorder %v536_v6, %v2299_v40  ;;  %vm541_vm4 = vcmp.ne.s32.totalorder %v537_v7, %v2302_v41 }
  0x9f   : > { %v2316_v55 = vpop.permute.xlu1 %578  ;;  %v605_v9 = vpop.permute.xlu0 %604 }
  0xa0   : > { %v607_v12 = vsel %vm606_vm0, %v2284_v25, %v605_v9  ;;  %v584_v17 = vunpack.c.l.b16 %v2316_v55  ;;  %v585_v18 = vunpack.c.h.b16 %v2316_v55 }
  0xa1   : > { %v429_v31 = vpop.f32.mrf.mxu0  ;;  %v615_v19 = vunpack.c.l.b16 %v607_v12  ;;  %v616_v20 = vunpack.c.h.b16 %v607_v12 }
  0xa2   : > { %v430_v34 = vadd.f32 %v429_v31, %v377_v26  ;;  %vm588_vm0 = vcmp.ne.s32.totalorder %v584_v17, %v2299_v40  ;;  %vm589_vm1 = vcmp.ne.s32.totalorder %v585_v18, %v2302_v41 }
  0xa3   : > { %v448_v32 = vpop.f32.mrf.mxu1  ;;  %v2292_v33 = vpop.permute.xlu2 %651  ;;  %vm619_vm2 = vcmp.ne.s32.totalorder %v615_v19, %v2299_v40  ;;  %vm2391_vm6 = vmpackc.low %vm589_vm1, %vm588_vm0 }
  0xa4   : > { %v449_v35 = vadd.f32 %v448_v32, %v377_v26  ;;  %v458_v38 = vmax.f32 %v430_v34, 0.0  ;;  %v608_v34 = vunpack.c.l.b16 %v2284_v25 }
  0xa6   : > { %v459_v39 = vmax.f32 %v449_v35, 0.0  ;;  %v609_v35 = vunpack.c.h.b16 %v2284_v25 }
  0xa7   : > { %v2337_v5 = vpop.permute.xlu1 %626 }
  0xa8   : > { %v466_v49 = vpack.c.bf16 %v459_v39, %v458_v38  ;;  %v632_v6 = vunpack.c.l.b16 %v2337_v5  ;;  %v633_v7 = vunpack.c.h.b16 %v2337_v5 }
  0xa9   : > { %v431_v42 = vpop.f32.mrf.mxu0 }
  0xaa   : > { %v432_v44 = vadd.f32 %v431_v42, %v382_v29  ;;  %v474_v56 = vunpack.c.l.b16 %v466_v49  ;;  %v475_v57 = vunpack.c.h.b16 %v466_v49  ;;  %v583_v49 = vsel %vm582_vm7, %v2316_v55, %v2286_v27 }
  0xab   : > { %v450_v43 = vpop.f32.mrf.mxu1  ;;  %v2304_v46 = vpop.permute.xlu2 %500  ;;  %v591_v55 = vunpack.c.l.b16 %v583_v49 }
  0xac   : > { %v451_v45 = vadd.f32 %v450_v43, %v382_v29  ;;  %v511_v47 = vunpack.c.l.b16 %v2304_v46  ;;  %v512_v48 = vunpack.c.h.b16 %v2304_v46  ;;  %v460_v50 = vmax.f32 %v432_v44, 0.0 }
  0xae   : > { %v461_v51 = vmax.f32 %v451_v45, 0.0  ;;  %vm515_vm9 = vcmp.ne.s32.totalorder %v511_v47, %v2299_v40  ;;  %vm516_vm10 = vcmp.ne.s32.totalorder %v512_v48, %v2302_v41 }
  0xaf   : > { %vm2312_vm11 = vmpackc.low %vm516_vm10, %vm515_vm9  ;;  %vm3332_vm10 = vcmask 138240   ;;  %v499_v21 = vpop.permute.xlu1 %498 }
  0xb0   : > { %v467_v53 = vpack.c.bf16 %v461_v51, %v460_v50  ;;  %v3354_v54 = vsel %vm2312_vm11, 4294967295, %v3353_v54  ;;  %vm2358_vm9 = vmpackc.low %vm541_vm4, %vm540_vm3  ;;  %v631_v24 = vsel %vm3332_vm10, %v2337_v5, %v2288_v28  ;;  %vm620_vm3 = vcmp.ne.s32.totalorder %v616_v20, %v2302_v41 }
  0xb1   : > { %v434_v10 = vpop.f32.mrf.mxu0  ;;  %v503_v26 = vsel %vm3333_vm12, %v499_v21, %v2304_v46  ;;  %vm2385_vm4 = vmpackc.low %vm548_vm14, %vm547_vm13  ;;  %v639_v36 = vunpack.c.l.b16 %v631_v24  ;;  %v640_v38 = vunpack.c.h.b16 %v631_v24  ;;  %vm612_vm13 = vcmp.ne.s32.totalorder %v608_v34, %v2299_v40  ;;  %v2505_v21 = vpop.permute.xlu0 %688 }
  0xb2   : > { %v476_v58 = vunpack.c.l.b16 %v467_v53  ;;  %v477_v59 = vunpack.c.h.b16 %v467_v53  ;;  %v504_v39 = vunpack.c.l.b16 %v503_v26  ;;  %v505_v42 = vunpack.c.h.b16 %v503_v26  ;;  %vm2395_vm10 = vmpackc.low %vm620_vm3, %vm619_vm2 }
  0xb3   : > { %v453_v11 = vpop.f32.mrf.mxu1  ;;  %v435_v44 = vadd.f32 %v434_v10, %v2290_v30  ;;  %vm613_vm14 = vcmp.ne.s32.totalorder %v609_v35, %v2302_v41  ;;  %vm643_vm0 = vcmp.ne.s32.totalorder %v639_v36, %v2299_v40  ;;  %vm644_vm1 = vcmp.ne.s32.totalorder %v640_v38, %v2302_v41  ;;  %v2494_v17 = vpop.permute.xlu2 %755 }
  0xb4   : > { %v2318_v63 = vpack.c.b16 %v476_v58, %v474_v56  ;;  %v2320_v0 = vpack.c.b16 %v477_v59, %v475_v57  ;;  %v454_v45 = vadd.f32 %v453_v11, %v2290_v30  ;;  %vm508_vm7 = vcmp.ne.s32.totalorder %v504_v39, %v2299_v40  ;;  %vm2423_vm3 = vmpackc.low %vm613_vm14, %vm612_vm13 }
  0xb5   : > { %vm509_vm2 = vcmp.ne.s32.totalorder %v505_v42, %v2302_v41  ;;  %v462_v27 = vmax.f32 %v435_v44, 0.0  ;;  %v3369_v53 = vmov 0  ;;  %v592_v56 = vunpack.c.h.b16 %v583_v49  ;;  %vm2431_vm8 = vmpackc.low %vm644_vm1, %vm643_vm0 }
  0xb6   : > { %753 = vrot.lane.b32.xlu2 %v2320_v0, %s2124_s25  ;;  %653 = vrot.lane.b32.xlu0 %v2318_v63, %s2114_s22  ;;  %v574_v8 = vsel %vm2333_vm15, %v2318_v63, 0  ;;  %v575_v22 = vsel %vm2352_vm5, %v2320_v0, 0  ;;  %v550_v23 = vsel %vm2358_vm9, %v2318_v63, 0  ;;  %v551_v47 = vsel %vm2385_vm4, %v2320_v0, 0  ;;  %vm2427_vm12 = vmpackc.low %vm509_vm2, %vm508_vm7 }
  0xb7   : > { %751 = vrot.lane.b32.xlu1 %v2318_v63, %s2124_s25  ;;  %v598_v48 = vsel %vm2391_vm6, %v2318_v63, 0  ;;  %v623_v30 = vsel %vm2395_vm10, %v2320_v0, 0  ;;  %v3370_v53 = vsel %vm2427_vm12, 4294967295, %v3369_v53  ;;  %v622_v60 = vsel %vm2423_vm3, %v2318_v63, 0  ;;  %v2532_v39 = vpop.permute.xlu1 %851 }
  0xb8   : > { %v518_v61 = vsel %vm2427_vm12, %v2318_v63, 0  ;;  %v647_v62 = vsel %vm2431_vm8, %v2320_v0, 0  ;;  %vm595_vm13 = vcmp.ne.s32.totalorder %v591_v55, %v2299_v40  ;;  %vm596_vm14 = vcmp.ne.s32.totalorder %v592_v56, %v2302_v41 }
  0xb9   : > { %v436_v29 = vpop.f32.mrf.mxu0  ;;  %vm2449_vm0 = vmpackc.low %vm596_vm14, %vm595_vm13  ;;  %vm636_vm1 = vcmp.ne.s32.totalorder %v632_v6, %v2299_v40  ;;  %vm637_vm7 = vcmp.ne.s32.totalorder %v633_v7, %v2302_v41  ;;  %v2517_v26 = vpop.permute.xlu0 %669  ;;  %vm3335_vm13 = vcmask 777216   ;;  %vm3377_vm14 = vcmask 1039360  }
  0xba   : > { %v437_v46 = vadd.f32 %v436_v29, %v2296_v37  ;;  %v599_v9 = vsel %vm2449_vm0, %v2320_v0, 0  ;;  %vm2467_vm2 = vmpackc.low %vm637_vm7, %vm636_vm1  ;;  %vm3336_vm1 = vcmask 916480   ;;  %vm3337_vm7 = vcmask 1031168  }
  0xbb   : > { %v455_v31 = vpop.f32.mrf.mxu1  ;;  %v646_v10 = vsel %vm2467_vm2, %v2318_v63, 0  ;;  %v2514_v24 = vpop.permute.xlu2 %774 }
  0xbc   : > { %v456_v25 = vadd.f32 %v455_v31, %v2296_v37  ;;  %v463_v37 = vmax.f32 %v454_v45, 0.0  ;;  %v464_v50 = vmax.f32 %v437_v46, 0.0 }
  0xbe   : > { %703 = vrot.lane.b32.xlu0 %v2318_v63, %s2120_s17  ;;  %690 = vrot.lane.b32.xlu2 %v574_v8, %s2119_s16  ;;  %v465_v51 = vmax.f32 %v456_v25, 0.0  ;;  %v468_v58 = vpack.c.bf16 %v463_v37, %v462_v27 }
  0xbf   : > { %655 = vrot.lane.b32.xlu1 %v2320_v0, %s2114_s22 }
  0xc0   : > { %v469_v59 = vpack.c.bf16 %v465_v51, %v464_v50  ;;  %v479_v1 = vunpack.c.h.b16 %v468_v58  ;;  %v478_v40 = vunpack.c.l.b16 %v468_v58 }
  0xc1   : > { %v2528_v35 = vpop.permute.xlu0 %740 }
  0xc2   : > { %v481_v2 = vunpack.c.h.b16 %v469_v59  ;;  %v480_v41 = vunpack.c.l.b16 %v469_v59 }
  0xc4   : > { %v2455_v8 = vpack.c.b16 %v481_v2, %v479_v1  ;;  %v484_v12 = vpack.c.b16 %v480_v41, %v478_v40 }
  0xc6   : > { %692 = vrot.lane.b32.xlu0 %v575_v22, %s2119_s16  ;;  %671 = vrot.lane.b32.xlu2 %v550_v23, %s2121_s21  ;;  %v577_v11 = vsel %vm2352_vm5, %v2455_v8, 0  ;;  %v553_v14 = vsel %vm2385_vm4, %v2455_v8, 0  ;;  %v600_v63 = vsel %vm2391_vm6, %v484_v12, 0  ;;  %v576_v15 = vsel %vm2333_vm15, %v484_v12, 0 }
  0xc7   : > { %705 = vrot.lane.b32.xlu1 %v2320_v0, %s2120_s17  ;;  %v624_v18 = vsel %vm2423_vm3, %v484_v12, 0  ;;  %v520_v19 = vsel %vm2427_vm12, %v484_v12, 0  ;;  %v552_v20 = vsel %vm2358_vm9, %v484_v12, 0  ;;  %v601_v22 = vsel %vm2449_vm0, %v2455_v8, 0 }
  0xc8   : > { %v625_v23 = vsel %vm2395_vm10, %v2455_v8, 0  ;;  %v648_v29 = vsel %vm2467_vm2, %v484_v12, 0  ;;  %v649_v31 = vsel %vm2431_vm8, %v2455_v8, 0  ;;  %vm3385_vm12 = vcmask 777216  }
  0xc9   : > { %v2530_v38 = vpop.permute.xlu0 %721 }
  0xce   : > { %673 = vrot.lane.b32.xlu0 %v551_v47, %s2121_s21  ;;  %717 = vrot.lane.b32.xlu2 %v598_v48, %s3344_s24 }
  0xcf   : > { %738 = vrot.lane.b32.xlu1 %v623_v30, %s3346_s23 }
  0xd6   : > { %736 = vrot.lane.b32.xlu0 %v622_v60, %s3346_s23  ;;  %853 = vrot.lane.b32.xlu2 %v518_v61, %s2118_s14 }
  0xd7   : > { %772 = vrot.lane.b32.xlu1 %v647_v62, %s3342_s26 }
  0xde   : > { %719 = vrot.lane.b32.xlu0 %v599_v9, %s3344_s24  ;;  %709 = vrot.lane.b32.xlu2 %v2455_v8, %s2120_s17 }
  0xdf   : > { %759 = vrot.lane.b32.xlu1 %v2455_v8, %s2124_s25 }
  0xe6   : > { %770 = vrot.lane.b32.xlu0 %v646_v10, %s3342_s26  ;;  %696 = vrot.lane.b32.xlu2 %v577_v11, %s2119_s16 }
  0xe7   : > { %659 = vrot.lane.b32.xlu1 %v2455_v8, %s2114_s22 }
  0xee   : > { %757 = vrot.lane.b32.xlu0 %v484_v12, %s2124_s25  ;;  %677 = vrot.lane.b32.xlu2 %v553_v14, %s2121_s21 }
  0xef   : > { %707 = vrot.lane.b32.xlu1 %v484_v12, %s2120_s17 }
  0xf6   : > { %657 = vrot.lane.b32.xlu0 %v484_v12, %s2114_s22  ;;  %723 = vrot.lane.b32.xlu2 %v600_v63, %s3344_s24 }
  0xf7   : > { %694 = vrot.lane.b32.xlu1 %v576_v15, %s2119_s16 }
  0xfe   : > { %742 = vrot.lane.b32.xlu0 %v624_v18, %s3346_s23  ;;  %857 = vrot.lane.b32.xlu2 %v520_v19, %s2118_s14 }
  0xff   : > { %675 = vrot.lane.b32.xlu1 %v552_v20, %s2121_s21 }
 0x106   : > { %725 = vrot.lane.b32.xlu0 %v601_v22, %s3344_s24 }
 0x107   : > { %744 = vrot.lane.b32.xlu1 %v625_v23, %s3346_s23 }
 0x10e   : > { %776 = vrot.lane.b32.xlu0 %v648_v29, %s3342_s26 }
 0x10f   : > { %778 = vrot.lane.b32.xlu1 %v649_v31, %s3342_s26  ;;  %s3424_s26 = smov 96  }
 0x110   : > { %v2526_v34 = vpop.permute.xlu2 %753 }
 0x118   : > { %v691_v36 = vpop.permute.xlu2 %690 }
 0x119   : > { %v699_v59 = vsel %vm3336_vm1, %v2505_v21, %v691_v36 }
 0x120   : > { %v672_v42 = vpop.permute.xlu2 %671 }
 0x121   : > { %v680_v1 = vsel %vm3337_vm7, %v2517_v26, %v672_v42 }
 0x128   : > { %v654_v44 = vpop.permute.xlu0 %653  ;;  %v718_v45 = vpop.permute.xlu2 %717 }
 0x129   : > { %v752_v46 = vpop.permute.xlu1 %751 }
 0x12a   : > { %933 = vrot.lane.b32.xlu1 %v752_v46, %s2118_s14  ;;  %v762_v25 = vsel %vm3335_vm13, %v752_v46, %v2526_v34  ;;  %vm3378_vm13 = vcmask 1039360  }
 0x12b   : > { %935 = vrot.lane.b32.xlu2 %v762_v25, %s2118_s14  ;;  %v661_v7 = vsel %vm3378_vm13, %v2292_v33, %v654_v44  ;;  %vm3380_vm13 = vcmask 777216  }
 0x130   : > { %v704_v47 = vpop.permute.xlu0 %703  ;;  %v2541_v49 = vpop.permute.xlu2 %853 }
 0x131   : > { %v2538_v48 = vpop.permute.xlu1 %655  ;;  %897 = vrot.lane.b32.xlu0 %v704_v47, %s2118_s14 }
 0x132   : > { %v662_v30 = vsel %vm3377_vm14, %v654_v44, %v2538_v48  ;;  %vm3339_vm14 = vcmask 900096  }
 0x133   : > { %863 = vrot.lane.b32.xlu2 %v662_v30, %s2118_s14 }
 0x138   : > { %v2546_v27 = vpop.permute.xlu0 %692  ;;  %v2554_v51 = vpop.permute.xlu2 %709 }
 0x139   : > { %v2548_v37 = vpop.permute.xlu1 %705  ;;  %v700_v50 = vsel %vm3336_vm1, %v691_v36, %v2546_v27  ;;  %vm3338_vm1 = vcmask 785408  }
 0x13a   : > { %887 = vrot.lane.b32.xlu0 %v700_v50, %s2118_s14 }
 0x13b   : > { %909 = vrot.lane.b32.xlu2 %v718_v45, %s2118_s14 }
 0x140   : > { %v2556_v55 = vpop.permute.xlu0 %673  ;;  %v697_v60 = vpop.permute.xlu2 %696 }
 0x141   : > { %v2558_v56 = vpop.permute.xlu1 %738  ;;  %v681_v58 = vsel %vm3337_vm7, %v672_v42, %v2556_v55  ;;  %vm3379_vm7 = vcmask 908288  }
 0x142   : > { %875 = vrot.lane.b32.xlu0 %v681_v58, %s2118_s14  ;;  %v711_v41 = vsel %vm3379_vm7, %v704_v47, %v2548_v37  ;;  %vm3382_vm7 = vcmask 916480  }
 0x143   : > { %885 = vrot.lane.b32.xlu2 %v699_v59, %s2118_s14 }
 0x148   : > { %v737_v61 = vpop.permute.xlu0 %736  ;;  %v678_v2 = vpop.permute.xlu2 %677 }
 0x149   : > { %v2566_v62 = vpop.permute.xlu1 %772  ;;  %921 = vrot.lane.b32.xlu1 %v737_v61, %s2118_s14  ;;  %v747_v11 = vsel %vm3338_vm1, %v737_v61, %v2558_v56  ;;  %vm3381_vm1 = vcmask 1039360  }
 0x14b   : > { %873 = vrot.lane.b32.xlu2 %v680_v1, %s2118_s14 }
 0x150   : > { %v720_v6 = vpop.permute.xlu0 %719  ;;  %v724_v14 = vpop.permute.xlu2 %723 }
 0x151   : > { %v760_v9 = vpop.permute.xlu1 %759  ;;  %861 = vrot.lane.b32.xlu1 %v661_v7, %s2118_s14  ;;  %v728_v10 = vsel %vm3339_vm14, %v718_v45, %v720_v6  ;;  %vm3384_vm14 = vcmask 1031168  }
 0x152   : > { %911 = vrot.lane.b32.xlu0 %v728_v10, %s2118_s14  ;;  %v765_v46 = vsel %vm3385_vm12, %v760_v9, %v2494_v17  ;;  %vm3387_vm12 = vcmask 785408  }
 0x153   : > { %923 = vrot.lane.b32.xlu2 %v747_v11, %s2118_s14 }
 0x158   : > { %v2580_v40 = vpop.permute.xlu0 %770  ;;  %v2615_v50 = vpop.permute.xlu2 %857 }
 0x159   : > { %v660_v12 = vpop.permute.xlu1 %659  ;;  %899 = vrot.lane.b32.xlu1 %v711_v41, %s2118_s14  ;;  %v519_v41 = vsel %vm2312_vm11, %v2320_v0, 0 }
 0x15b   : > { %915 = vrot.lane.b32.xlu2 %v724_v14, %s2118_s14 }
 0x160   : > { %v758_v63 = vpop.permute.xlu0 %757 }
 0x161   : > { %v708_v15 = vpop.permute.xlu1 %707  ;;  %939 = vrot.lane.b32.xlu0 %v758_v63, %s2118_s14  ;;  %v764_v18 = vsel %vm3380_vm13, %v758_v63, %v760_v9  ;;  %vm3383_vm13 = vcmask 908288  }
 0x162   : > { %941 = vrot.lane.b32.xlu1 %v764_v18, %s2118_s14  ;;  %v712_v36 = vsel %vm3383_vm13, %v708_v15, %v2554_v51  ;;  %vm3386_vm13 = vcmask 900096  }
 0x168   : > { %v658_v19 = vpop.permute.xlu0 %657 }
 0x169   : > { %v695_v20 = vpop.permute.xlu1 %694  ;;  %903 = vrot.lane.b32.xlu0 %v708_v15, %s2118_s14  ;;  %v664_v22 = vsel %vm3381_vm1, %v658_v19, %v660_v12  ;;  %v663_v44 = vsel %vm3381_vm1, %v2292_v33, %v658_v19  ;;  %vm3388_vm1 = vmmov %vm3387_vm12  ;;  %v795_v15 = vld [vmem:[%s3324_s4 + $0x10] sm:$0xff]  ;;  %v794_v19 = vld [vmem:[%s3324_s4 + $0x8] sm:$0xff] }
 0x16a   : > { %869 = vrot.lane.b32.xlu1 %v664_v22, %s2118_s14  ;;  %v702_v23 = vsel %vm3382_vm7, %v695_v20, %v697_v60  ;;  %v701_v45 = vsel %vm3382_vm7, %v2505_v21, %v695_v20  ;;  %vm3389_vm7 = vcmask 777216   ;;  %v796_v20 = vld [vmem:[%s3324_s4 + $0x18] sm:$0xff] }
 0x16b   : > { %893 = vrot.lane.b32.xlu2 %v702_v23, %s2118_s14 }
 0x170   : > { %v743_v29 = vpop.permute.xlu0 %742 }
 0x171   : > { %v676_v31 = vpop.permute.xlu1 %675  ;;  %927 = vrot.lane.b32.xlu0 %v743_v29, %s2118_s14 }
 0x172   : > { %905 = vrot.lane.b32.xlu1 %v712_v36, %s2118_s14  ;;  %v683_v42 = vsel %vm3384_vm14, %v676_v31, %v678_v2  ;;  %v682_v25 = vsel %vm3384_vm14, %v2517_v26, %v676_v31  ;;  %vm3390_vm14 = vmmov %vm3386_vm13 }
 0x173   : > { %881 = vrot.lane.b32.xlu2 %v683_v42, %s2118_s14  ;;  %v729_v1 = vsel %vm3390_vm14, %v720_v6, %v2530_v38 }
 0x178   : > { %v726_v47 = vpop.permute.xlu0 %725 }
 0x179   : > { %867 = vrot.lane.b32.xlu0 %v663_v44, %s2118_s14  ;;  %v745_v30 = vpop.permute.xlu1 %744  ;;  %v730_v58 = vsel %vm3386_vm13, %v724_v14, %v726_v47  ;;  %vm3391_vm13 = vmmov %vm3388_vm1 }
 0x17a   : > { %891 = vrot.lane.b32.xlu1 %v701_v45, %s2118_s14  ;;  %v749_v59 = vsel %vm3387_vm12, %v743_v29, %v745_v30  ;;  %vm3348_vm12 = vcmask 769024  }
 0x17b   : > { %943 = vrot.lane.b32.xlu2 %v765_v46, %s2118_s14 }
 0x181   : > { %895 = vrot.lane.b32.xlu0 %v697_v60, %s2118_s14  ;;  %v748_v60 = vsel %vm3388_vm1, %v2558_v56, %v2528_v35  ;;  %vm3392_vm1 = vmmov %vm3390_vm14 }
 0x182   : > { %879 = vrot.lane.b32.xlu1 %v682_v25, %s2118_s14 }
 0x183   : > { %889 = vrot.lane.b32.xlu2 %v2546_v27, %s2118_s14  ;;  %v763_v27 = vsel %vm3389_vm7, %v2526_v34, %v2494_v17  ;;  %v521_v34 = vsel %vm2312_vm11, %v2455_v8, 0  ;;  %v779_v8 = vpop.permute.xlu1 %778  ;;  %vm3393_vm7 = vcmask 138240  }
 0x184   : > { %v784_v14 = vsel %vm3348_vm12, %v779_v8, %v2514_v24  ;;  %vm3394_vm14 = vmmov %vm3393_vm7 }
 0x185   : > { %v2625_v61 = vpop.permute.xlu2 %935 }
 0x189   : > { %917 = vrot.lane.b32.xlu0 %v730_v58, %s2118_s14 }
 0x18a   : > { %929 = vrot.lane.b32.xlu1 %v749_v59, %s2118_s14 }
 0x18b   : > { %925 = vrot.lane.b32.xlu2 %v748_v60, %s2118_s14 }
 0x18d   : > { %v2637_v56 = vpop.permute.xlu2 %863 }
 0x191   : > { %877 = vrot.lane.b32.xlu0 %v2556_v55, %s2118_s14  ;;  %v750_v55 = vsel %vm3391_vm13, %v745_v30, %v2528_v35  ;;  %vm3395_vm13 = vmmov %vm3393_vm7 }
 0x192   : > { %937 = vrot.lane.b32.xlu1 %v763_v27, %s2118_s14 }
 0x193   : > { %871 = vrot.lane.b32.xlu2 %v660_v12, %s2118_s14 }
 0x195   : > { %v2651_v6 = vpop.permute.xlu2 %909 }
 0x199   : > { %913 = vrot.lane.b32.xlu0 %v729_v1, %s2118_s14 }
 0x19a   : > { %883 = vrot.lane.b32.xlu1 %v678_v2, %s2118_s14  ;;  %v777_v2 = vpop.permute.xlu0 %776 }
 0x19b   : > { %907 = vrot.lane.b32.xlu2 %v2554_v51, %s2118_s14  ;;  %v781_v51 = vsel %vm3348_vm12, %v2580_v40, %v2566_v62  ;;  %v783_v10 = vsel %vm3348_vm12, %v777_v2, %v779_v8 }
 0x19c   : > { %v934_v11 = vpop.permute.xlu1 %933 }
 0x19d   : > { %v886_v7 = vpop.permute.xlu2 %885  ;;  %v985_v45 = vsel %vm3394_vm14, %v934_v11, %v2625_v61 }
 0x1a1   : > { %931 = vrot.lane.b32.xlu0 %v750_v55, %s2118_s14 }
 0x1a2   : > { %865 = vrot.lane.b32.xlu1 %v2538_v48, %s2118_s14  ;;  %v782_v48 = vsel %vm3348_vm12, %v2566_v62, %v2514_v24 }
 0x1a3   : > { %859 = vrot.lane.b32.xlu2 %v521_v34, %s2118_s14  ;;  %v2663_v9 = vpop.permute.xlu0 %897 }
 0x1a5   : > { %v874_v62 = vpop.permute.xlu2 %873 }
 0x1a9   : > { %901 = vrot.lane.b32.xlu0 %v2548_v37, %s2118_s14  ;;  %v731_v37 = vsel %vm3392_vm1, %v726_v47, %v2530_v38  ;;  %vm3396_vm1 = vmmov %vm3393_vm7 }
 0x1aa   : > { %947 = vrot.lane.b32.xlu1 %v781_v51, %s2118_s14  ;;  %vm3398_vm14 = vmmov %vm3396_vm1 }
 0x1ab   : > { %949 = vrot.lane.b32.xlu2 %v782_v48, %s2118_s14  ;;  %vm3399_vm12 = vmmov %vm3396_vm1 }
 0x1ac   : > { %v888_v12 = vpop.permute.xlu0 %887  ;;  %vm3400_vm11 = vmmov %vm3396_vm1 }
 0x1ad   : > { %v969_v55 = vsel %vm3396_vm1, %v886_v7, %v888_v12 }
 0x1b1   : > { %953 = vrot.lane.b32.xlu0 %v783_v10, %s2118_s14 }
 0x1b2   : > { %919 = vrot.lane.b32.xlu1 %v731_v37, %s2118_s14 }
 0x1b3   : > { %945 = vrot.lane.b32.xlu2 %v2580_v40, %s2118_s14  ;;  %v2682_v40 = vpop.permute.xlu2 %923 }
 0x1b4   : > { %v2685_v18 = vpop.permute.xlu0 %875 }
 0x1b5   : > { %v965_v37 = vsel %vm3400_vm11, %v874_v62, %v2685_v18  ;;  %vm3404_vm11 = vmmov %vm3396_vm1 }
 0x1b9   : > { %855 = vrot.lane.b32.xlu0 %v519_v41, %s2118_s14 }
 0x1ba   : > { %955 = vrot.lane.b32.xlu1 %v784_v14, %s2118_s14 }
 0x1bb   : > { %v922_v63 = vpop.permute.xlu1 %921  ;;  %v916_v29 = vpop.permute.xlu2 %915 }
 0x1c1   : > { %809 = vperm.xlu0 %2046, %v795_v15  }
 0x1c2   : > { %951 = vrot.lane.b32.xlu1 %v777_v2, %s2118_s14 }
 0x1c3   : > { %v862_v0 = vpop.permute.xlu1 %861 }
 0x1c4   : > { %v2693_v22 = vpop.permute.xlu0 %911 }
 0x1c5   : > { %v894_v36 = vpop.permute.xlu2 %893 }
 0x1c9   : > { %804 = vperm.xlu0 %2046, %v794_v19  }
 0x1ca   : > { %814 = vperm.xlu1 %2047, %v796_v20  }
 0x1cb   : > { %v2695_v23 = vpop.permute.xlu1 %899 }
 0x1cd   : > { %v882_v47 = vpop.permute.xlu2 %881 }
 0x1d3   : > { %v940_v31 = vpop.permute.xlu0 %939 }
 0x1d4   : > { %v942_v42 = vpop.permute.xlu1 %941 }
 0x1d5   : > { %v987_v44 = vsel %vm3393_vm7, %v940_v31, %v942_v42  ;;  %v944_v59 = vpop.permute.xlu2 %943  ;;  %vm3397_vm7 = vmmov %vm3396_vm1  ;;  %v959_v31 = vsel %vm3404_vm11, %v2532_v39, %v2615_v50 }
 0x1d6   : > { %1055 = vmatpush.bf16.msra.mxu3 %v987_v44  ;;  %vm3409_vm11 = vmmov %vm3396_vm1 }
 0x1da   : > { %1056 = vmatpush.bf16.msra.mxu3 %v985_v45 }
 0x1db   : > { %v904_v46 = vpop.permute.xlu0 %903 }
 0x1dc   : > { %v2700_v25 = vpop.permute.xlu1 %869 }
 0x1dd   : > { %v890_v34 = vpop.permute.xlu2 %889 }
 0x1de   : > { %v970_v10 = vsel %vm3399_vm12, %v888_v12, %v890_v34  ;;  %vm3403_vm12 = vmmov %vm3396_vm1 }
 0x1df   : > { %v981_v12 = vsel %vm3403_vm12, %v922_v63, %v2682_v40  ;;  %v1969_v63 = vld [vmem:[%s3323_s3 + $0x8] sm:$0xf0]  ;;  %vm3408_vm12 = vmmov %vm3396_vm1 }
 0x1e3   : > { %v928_v30 = vpop.permute.xlu0 %927 }
 0x1e4   : > { %v2702_v58 = vpop.permute.xlu1 %905 }
 0x1e5   : > { %v926_v7 = vpop.permute.xlu2 %925 }
 0x1eb   : > { %v868_v60 = vpop.permute.xlu0 %867 }
 0x1ec   : > { %v892_v27 = vpop.permute.xlu1 %891 }
 0x1ed   : > { %v971_v1 = vsel %vm3395_vm13, %v892_v27, %v894_v36  ;;  %vm3401_vm13 = vmmov %vm3396_vm1  ;;  %v872_v44 = vpop.permute.xlu2 %871 }
 0x1ee   : > { %1036 = vmatpush.bf16.msra.mxu2 %v971_v1  ;;  %v963_v14 = vsel %vm3401_vm13, %v868_v60, %v2700_v25  ;;  %vm3406_vm13 = vmmov %vm3396_vm1 }
 0x1ef   : > { %v957_v45 = vsel %vm3406_vm13, %v2532_v39, %v2541_v49  ;;  %vm3411_vm13 = vmmov %vm3396_vm1 }
 0x1f2   : > { %1037 = vmatpush.bf16.msra.mxu2 %v969_v55  ;;  %v975_v55 = vsel %vm3408_vm12, %v904_v46, %v2702_v58  ;;  %v973_v46 = vsel %vm3411_vm13, %v2663_v9, %v2695_v23  ;;  %vm3413_vm12 = vmmov %vm3396_vm1  ;;  %v1906_v9 = vld [vmem:[%s3323_s3 + $0x18] sm:$0xf] }
 0x1f3   : > { %v896_v2 = vpop.permute.xlu0 %895  ;;  %vm3416_vm13 = vmmov %vm3396_vm1 }
 0x1f4   : > { %v880_v51 = vpop.permute.xlu1 %879  ;;  %v972_v48 = vsel %vm3397_vm7, %v894_v36, %v896_v2  ;;  %vm3402_vm7 = vmmov %vm3396_vm1  ;;  %v1968_v2 = vld [vmem:[%s3323_s3 + $0x4] sm:$0xf] }
 0x1f5   : > { %1093 = vmatpush.bf16.msrb.mxu1 %v972_v48  ;;  %v967_v8 = vsel %vm3398_vm14, %v880_v51, %v882_v47  ;;  %v961_v19 = vsel %vm3402_vm7, %v862_v0, %v2637_v56  ;;  %vm3405_vm14 = vmmov %vm3396_vm1  ;;  %v1894_v0 = vld [vmem:[%s3323_s3] sm:$0xf] }
 0x1f6   : > { %1038 = vmatpush.bf16.msra.mxu2 %v967_v8  ;;  %vm3407_vm7 = vmmov %vm3396_vm1 }
 0x1f7   : > { %v988_v60 = vsel %vm3407_vm7, %v942_v42, %v944_v59  ;;  %v1896_v42 = vld [vmem:[%s3323_s3 + $0xc] sm:$0xf0]  ;;  %v908_v59 = vpop.permute.xlu2 %907  ;;  %vm3412_vm7 = vmmov %vm3396_vm1 }
 0x1f8   : > { %v1899_v51 = vor.u32 %v1968_v2, %v1896_v42 }
 0x1f9   : > { %1094 = vmatpush.bf16.msrb.mxu1 %v970_v10  ;;  %v964_v10 = vsel %vm3413_vm12, %v2700_v25, %v872_v44  ;;  %vm3418_vm12 = vmmov %vm3396_vm1 }
 0x1fa   : > { %1039 = vmatpush.bf16.msra.mxu2 %v965_v37 }
 0x1fb   : > { %v2711_v11 = vpop.permute.xlu0 %917 }
 0x1fc   : > { %v930_v41 = vpop.permute.xlu1 %929  ;;  %v979_v36 = vsel %vm3405_vm14, %v916_v29, %v2711_v11  ;;  %v2737_v29 = vor.u32 %v1969_v63, %v1894_v0  ;;  %vm3410_vm14 = vmmov %vm3396_vm1 }
 0x1fd   : > { %v983_v15 = vsel %vm3396_vm1, %v928_v30, %v930_v41  ;;  %v977_v30 = vsel %vm3396_vm1, %v2651_v6, %v2693_v22 }
 0x1fe   : > { %1040 = vmatpush.bf16.msra.mxu2 %v963_v14  ;;  %1057 = vmatpush.bf16.msra.mxu3 %v983_v15 }
 0x1ff   : > { %v860_v15 = vpop.permute.xlu2 %859 }
 0x202   : > { %1041 = vmatpush.bf16.msra.mxu2 %v961_v19  ;;  %1058 = vmatpush.bf16.msra.mxu3 %v981_v12  ;;  %v960_v12 = vsel %vm3416_vm13, %v2615_v50, %v860_v15  ;;  %vm3421_vm13 = vmmov %vm3396_vm1 }
 0x203   : > { %v878_v62 = vpop.permute.xlu0 %877 }
 0x204   : > { %v938_v20 = vpop.permute.xlu1 %937 }
 0x205   : > { %v986_v6 = vsel %vm3410_vm14, %v2625_v61, %v938_v20  ;;  %vm3415_vm14 = vmmov %vm3396_vm1 }
 0x206   : > { %1042 = vmatpush.bf16.msra.mxu2 %v959_v31  ;;  %1059 = vmatpush.bf16.msra.mxu3 %v979_v36 }
 0x20a   : > { %1043 = vmatpush.bf16.msra.mxu2 %v957_v45  ;;  %1060 = vmatpush.bf16.msra.mxu3 %v977_v30 }
 0x20b   : > { %v914_v27 = vpop.permute.xlu0 %913 }
 0x20c   : > { %v884_v1 = vpop.permute.xlu1 %883 }
 0x20d   : > { %1044 = vmatmul.bf16.vlgmr.msra.gmra.mxu2 %v2737_v29  ;;  %v968_v34 = vsel %vm3409_vm11, %v882_v47, %v884_v1  ;;  %v966_v47 = vsel %vm3396_vm1, %v2685_v18, %v878_v62  ;;  %v1972_v18 = vld [vmem:[%s3323_s3 + $0x20] sm:$0xf0]  ;;  %vm3414_vm11 = vmmov %vm3396_vm1  ;;  %v1971_v62 = vld [vmem:[%s3323_s3 + $0x1c] sm:$0xf] }
 0x20e   : > { %1112 = vmatpush.bf16.msrb.mxu2 %v988_v60  ;;  %1061 = vmatpush.bf16.msra.mxu3 %v975_v55  ;;  %v982_v37 = vsel %vm3414_vm11, %v2682_v40, %v926_v7  ;;  %v1907_v14 = vor.u32 %v1972_v18, %v1906_v9  ;;  %v1908_v40 = vld [vmem:[%s3323_s3 + $0x24] sm:$0xf0]  ;;  %vm3419_vm11 = vmmov %vm3396_vm1  ;;  %v950_v60 = vpop.permute.xlu2 %949 }
 0x20f   : > { %1095 = vmatpush.bf16.msrb.mxu1 %v968_v34  ;;  %v1911_v7 = vor.u32 %v1971_v62, %v1908_v40  ;;  %v976_v45 = vsel %vm3419_vm11, %v2702_v58, %v908_v59  ;;  %vm3423_vm11 = vmmov %vm3396_vm1 }
 0x212   : > { %1113 = vmatpush.bf16.msrb.mxu2 %v986_v6  ;;  %1062 = vmatpush.bf16.msra.mxu3 %v973_v46 }
 0x213   : > { %1096 = vmatpush.bf16.msrb.mxu1 %v966_v47  ;;  %v932_v61 = vpop.permute.xlu0 %931 }
 0x214   : > { %v866_v48 = vpop.permute.xlu1 %865  ;;  %v984_v8 = vsel %vm3412_vm7, %v930_v41, %v932_v61  ;;  %vm3417_vm7 = vmmov %vm3396_vm1 }
 0x215   : > { %1063 = vmatmul.bf16.vlgmr.msra.gmra.mxu3 %v1899_v51  ;;  %v962_v41 = vsel %vm3415_vm14, %v2637_v56, %v866_v48  ;;  %v793_v56 = vld [vmem:[%s3324_s4] sm:$0xff]  ;;  %v978_v36 = vsel %vm3417_vm7, %v2693_v22, %v914_v27  ;;  %vm3420_vm14 = vmmov %vm3396_vm1  ;;  %v1970_v22 = vld [vmem:[%s3323_s3 + $0x10] sm:$0xf0]  ;;  %vm1029_vm7 = vcmask 261120  }
 0x216   : > { %1114 = vmatpush.bf16.msrb.mxu2 %v984_v8  ;;  %799 = vperm.xlu2 %2048, %v793_v56   ;;  %v946_v34 = vpop.permute.xlu2 %945 }
 0x217   : > { %1097 = vmatpush.bf16.msrb.mxu1 %v964_v10 }
 0x21a   : > { %1115 = vmatpush.bf16.msrb.mxu2 %v982_v37 }
 0x21b   : > { %1098 = vmatpush.bf16.msrb.mxu1 %v962_v41  ;;  %v902_v25 = vpop.permute.xlu0 %901 }
 0x21c   : > { %v948_v19 = vpop.permute.xlu1 %947 }
 0x21d   : > { %1049 = vmatmul.bf16.gmra.mxu2 %v1907_v14  ;;  %v990_v58 = vsel %vm3396_vm1, %v948_v19, %v950_v60  ;;  %v989_v6 = vsel %vm3423_vm11, %v946_v34, %v948_v19 }
 0x21f   : > { %1099 = vmatpush.bf16.msrb.mxu1 %v960_v12 }
 0x223   : > { %v954_v20 = vpop.permute.xlu0 %953 }
 0x224   : > { %v920_v31 = vpop.permute.xlu1 %919 }
 0x225   : > { %1068 = vmatmul.bf16.gmra.mxu3 %v1911_v7  ;;  %v980_v50 = vsel %vm3396_vm1, %v2711_v11, %v920_v31  ;;  %v1902_v11 = vld [vmem:[%s3323_s3 + $0x8] sm:$0xf] }
 0x226   : > { %1116 = vmatpush.bf16.msrb.mxu2 %v980_v50  ;;  %v1903_v27 = vor.u32 %v1970_v22, %v1902_v11 }
 0x22a   : > { %1117 = vmatpush.bf16.msrb.mxu2 %v978_v36 }
 0x22b   : > { %v856_v44 = vpop.permute.xlu0 %855 }
 0x22c   : > { %v956_v0 = vpop.permute.xlu1 %955  ;;  %v958_v63 = vsel %vm3418_vm12, %v2541_v49, %v856_v44  ;;  %v974_v49 = vsel %vm3421_vm13, %v2695_v23, %v902_v25  ;;  %vm3422_vm12 = vmmov %vm3396_vm1  ;;  %v1914_v23 = vld [vmem:[%s3323_s3 + $0x20] sm:$0xf] }
 0x22d   : > { %1100 = vmatpush.bf16.msrb.mxu1 %v958_v63  ;;  %v992_v30 = vsel %vm3420_vm14, %v954_v20, %v956_v0  ;;  %vm3427_vm14 = vnez %v3370_v53 }
 0x22e   : > { %1118 = vmatpush.bf16.msrb.mxu2 %v976_v45  ;;  %1137 = vmatpush.bf16.msrb.mxu3 %v992_v30 }
 0x230   : > { %1101 = vmatmul.bf16.vlgmr.msrb.gmra.mxu1 %v2737_v29  ;;  %v1973_v29 = vld [vmem:[%s3323_s3 + $0x28] sm:$0xf0] }
 0x231   : > { %v1915_v2 = vor.u32 %v1973_v29, %v1914_v23 }
 0x232   : > { %1119 = vmatpush.bf16.msrb.mxu2 %v974_v49  ;;  %1138 = vmatpush.bf16.msrb.mxu3 %v990_v58 }
 0x233   : > { %v810_v9 = vpop.permute.xlu0 %809 }
 0x234   : > { %v952_v1 = vpop.permute.xlu1 %951 }
 0x235   : > { %1120 = vmatmul.bf16.vlgmr.msrb.gmra.mxu2 %v1899_v51  ;;  %v991_v55 = vsel %vm3422_vm12, %v952_v1, %v954_v20  ;;  %1918 = vmatmul.msk.bf16.vlgmr.msrb.gmra.mxu3 %vm1029_vm7, %v1903_v27  ;;  %vm3440_vm12 = vcmask 908288  }
 0x236   : > { %1080 = vmatpush.bf16.msrb.mxu0 %v991_v55 }
 0x23a   : > { %1081 = vmatpush.bf16.msrb.mxu0 %v989_v6 }
 0x23d   : > { %1916 = vmatmul.msk.bf16.vlgmr.msrb.gmra.mxu0 %vm1029_vm7, %v1903_v27 }
 0x240   : > { %1106 = vmatmul.bf16.gmra.mxu1 %v1907_v14 }
 0x245   : > { %1125 = vmatmul.bf16.gmra.mxu2 %v1911_v7  ;;  %1919 = vmatmul.msk.bf16.gmra.mxu3 %vm1029_vm7, %v1915_v2  ;;  %v805_v7 = vpop.permute.xlu0 %804 }
 0x24d   : > { %1917 = vmatmul.msk.bf16.gmra.mxu0 %vm1029_vm7, %v1915_v2 }
 0x270   : > { %v800_v18 = vpop.permute.xlu2 %799 }
 0x290   : > { %v1045_v42 = vpop.f32.mrf.mxu2 }
 0x291   : > { %v1046_v41 = vadd.f32 %v1045_v42, %v800_v18 }
 0x298   : > { %v1064_v59 = vpop.f32.mrf.mxu3  ;;  %v1047_v46 = vpop.f32.mrf.mxu2 }
 0x299   : > { %v1065_v12 = vadd.f32 %v1064_v59, %v1046_v41  ;;  %v1048_v20 = vadd.f32 %v1047_v46, %v805_v7 }
 0x2a0   : > { %v1066_v47 = vpop.f32.mrf.mxu3  ;;  %v2812_v51 = vpop.f32.mrf.mxu2 }
 0x2a1   : > { %v1067_v36 = vadd.f32 %v1066_v47, %v1048_v20 }
 0x2a8   : > { %v2814_v61 = vpop.f32.mrf.mxu3  ;;  %v1052_v48 = vpop.f32.mrf.mxu2 }
 0x2ad   : > { %v1102_v10 = vpop.f32.mrf.mxu1 }
 0x2ae   : > { %v1103_v37 = vadd.f32 %v1102_v10, %v800_v18  ;;  %v815_v18 = vpop.permute.xlu1 %814 }
 0x2b0   : > { %v1071_v8 = vpop.f32.mrf.mxu3 }
 0x2b5   : > { %v1104_v62 = vpop.f32.mrf.mxu1 }
 0x2b6   : > { %v1105_v31 = vadd.f32 %v1104_v62, %v805_v7 }
 0x2b8   : > { %v1121_v14 = vpop.f32.mrf.mxu2  ;;  %v1140_v15 = vpop.f32.mrf.mxu3 }
 0x2b9   : > { %v1122_v25 = vadd.f32 %v1121_v14, %v1103_v37 }
 0x2ba   : > { %v1083_v19 = vpop.f32.mrf.mxu0 }
 0x2bb   : > { %v1084_v40 = vadd.f32 %v1083_v19, %v1065_v12  ;;  %v1141_v56 = vadd.f32 %v1140_v15, %v1122_v25  ;;  %v1053_v25 = vadd.f32 %v1052_v48, %v815_v18 }
 0x2bd   : > { %v1150_v44 = vmax.f32 %v1084_v40, 0.0  ;;  %v1151_v0 = vmax.f32 %v1141_v56, 0.0  ;;  %v1107_v2 = vpop.f32.mrf.mxu1  ;;  %v1051_v56 = vadd.f32 %v2812_v51, %v810_v9  ;;  %v1072_v7 = vadd.f32 %v1071_v8, %v1053_v25 }
 0x2be   : > { %v1108_v19 = vadd.f32 %v1107_v2, %v810_v9 }
 0x2bf   : > { %v1158_v22 = vpack.c.bf16 %v1151_v0, %v1150_v44 }
 0x2c0   : > { %v1123_v50 = vpop.f32.mrf.mxu2  ;;  %v1142_v30 = vpop.f32.mrf.mxu3 }
 0x2c1   : > { %v1124_v63 = vadd.f32 %v1123_v50, %v1105_v31  ;;  %v1166_v1 = vunpack.c.l.b16 %v1158_v22  ;;  %v1167_v55 = vunpack.c.h.b16 %v1158_v22  ;;  %v1070_v31 = vadd.f32 %v2814_v61, %v1051_v56 }
 0x2c2   : > { %v1085_v45 = vpop.f32.mrf.mxu0 }
 0x2c3   : > { %v1086_v60 = vadd.f32 %v1085_v45, %v1067_v36  ;;  %v1143_v11 = vadd.f32 %v1142_v30, %v1124_v63 }
 0x2c5   : > { %v1152_v49 = vmax.f32 %v1086_v60, 0.0  ;;  %v1153_v58 = vmax.f32 %v1143_v11, 0.0  ;;  %v1109_v10 = vpop.f32.mrf.mxu1 }
 0x2c6   : > { %v1110_v15 = vadd.f32 %v1109_v10, %v815_v18 }
 0x2c7   : > { %v1159_v27 = vpack.c.bf16 %v1153_v58, %v1152_v49 }
 0x2c8   : > { %v1126_v42 = vpop.f32.mrf.mxu2  ;;  %v1145_v47 = vpop.f32.mrf.mxu3 }
 0x2c9   : > { %v1168_v34 = vunpack.c.l.b16 %v1159_v27  ;;  %v1169_v6 = vunpack.c.h.b16 %v1159_v27  ;;  %v1127_v20 = vadd.f32 %v1126_v42, %v1108_v19 }
 0x2ca   : > { %v1088_v46 = vpop.f32.mrf.mxu0 }
 0x2cb   : > { %v1174_v23 = vpack.c.b16 %v1168_v34, %v1166_v1  ;;  %v2816_v29 = vpack.c.b16 %v1169_v6, %v1167_v55  ;;  %v1089_v63 = vadd.f32 %v1088_v46, %v1070_v31  ;;  %v1146_v48 = vadd.f32 %v1145_v47, %v1127_v20 }
 0x2cd   : > { %1294 = vrot.lane.b32.xlu2 %v2816_v29, %s2124_s25  ;;  %1206 = vrot.lane.b32.xlu0 %v1174_v23, %s2114_s22  ;;  %v1190_v59 = vsel %vm2333_vm15, %v1174_v23, 0  ;;  %v1191_v41 = vsel %vm2352_vm5, %v2816_v29, 0  ;;  %v1187_v14 = vsel %vm2385_vm4, %v2816_v29, 0  ;;  %v1198_v44 = vsel %vm2423_vm3, %v1174_v23, 0 }
 0x2ce   : > { %1292 = vrot.lane.b32.xlu1 %v1174_v23, %s2124_s25  ;;  %v1194_v0 = vsel %vm2391_vm6, %v1174_v23, 0  ;;  %v1186_v51 = vsel %vm2358_vm9, %v1174_v23, 0  ;;  %v1154_v9 = vmax.f32 %v1089_v63, 0.0  ;;  %v1155_v45 = vmax.f32 %v1146_v48, 0.0 }
 0x2cf   : > { %v1195_v60 = vsel %vm2449_vm0, %v2816_v29, 0  ;;  %v1202_v11 = vsel %vm2467_vm2, %v1174_v23, 0  ;;  %v1199_v49 = vsel %vm2395_vm10, %v2816_v29, 0  ;;  %v1203_v55 = vsel %vm2431_vm8, %v2816_v29, 0 }
 0x2d0   : > { %v1128_v37 = vpop.f32.mrf.mxu2  ;;  %v1147_v40 = vpop.f32.mrf.mxu3  ;;  %v1160_v22 = vpack.c.bf16 %v1155_v45, %v1154_v9  ;;  %v1182_v34 = vsel %vm3427_vm14, %v1174_v23, 0 }
 0x2d1   : > { %v1129_v12 = vadd.f32 %v1128_v37, %v1110_v15 }
 0x2d2   : > { %v1090_v62 = vpop.f32.mrf.mxu0  ;;  %v1170_v27 = vunpack.c.l.b16 %v1160_v22  ;;  %v1171_v2 = vunpack.c.h.b16 %v1160_v22 }
 0x2d3   : > { %v1091_v50 = vadd.f32 %v1090_v62, %v1072_v7  ;;  %v1148_v36 = vadd.f32 %v1147_v40, %v1129_v12 }
 0x2d5   : > { %1250 = vrot.lane.b32.xlu0 %v1174_v23, %s2120_s17  ;;  %1238 = vrot.lane.b32.xlu2 %v1190_v59, %s2119_s16  ;;  %v1156_v61 = vmax.f32 %v1091_v50, 0.0  ;;  %v1157_v8 = vmax.f32 %v1148_v36, 0.0 }
 0x2d6   : > { %1208 = vrot.lane.b32.xlu1 %v2816_v29, %s2114_s22 }
 0x2d7   : > { %v1161_v30 = vpack.c.bf16 %v1157_v8, %v1156_v61 }
 0x2d9   : > { %v1172_v58 = vunpack.c.l.b16 %v1161_v30  ;;  %v1173_v6 = vunpack.c.h.b16 %v1161_v30 }
 0x2db   : > { %v1176_v1 = vpack.c.b16 %v1172_v58, %v1170_v27  ;;  %v2868_v42 = vpack.c.b16 %v1173_v6, %v1171_v2 }
 0x2dd   : > { %1240 = vrot.lane.b32.xlu0 %v1191_v41, %s2119_s16  ;;  %1224 = vrot.lane.b32.xlu2 %v1187_v14, %s2121_s21  ;;  %v1193_v59 = vsel %vm2352_vm5, %v2868_v42, 0  ;;  %v1188_v23 = vsel %vm2358_vm9, %v1176_v1, 0  ;;  %v1200_v46 = vsel %vm2423_vm3, %v1176_v1, 0  ;;  %v1192_v13 = vsel %vm2333_vm15, %v1176_v1, 0 }
 0x2de   : > { %1252 = vrot.lane.b32.xlu1 %v2816_v29, %s2120_s17  ;;  %v1201_v47 = vsel %vm2395_vm10, %v2868_v42, 0  ;;  %v1197_v16 = vsel %vm2449_vm0, %v2868_v42, 0  ;;  %v1189_v52 = vsel %vm2385_vm4, %v2868_v42, 0  ;;  %v1205_v4 = vsel %vm2431_vm8, %v2868_v42, 0 }
 0x2df   : > { %v1204_v43 = vsel %vm2467_vm2, %v1176_v1, 0  ;;  %v1196_v3 = vsel %vm2391_vm6, %v1176_v1, 0  ;;  %v1184_v32 = vsel %vm3427_vm14, %v1176_v1, 0  ;;  %vm3428_vm8 = vcmask 777216  }
 0x2e0   : > { %vm3429_vm6 = vcmask 1039360   ;;  %vm3430_vm15 = vcmask 916480   ;;  %vm3431_vm5 = vcmask 1031168   ;;  %vm3434_vm4 = vcmask 900096   ;;  %vm3437_vm2 = vmmov %vm3428_vm8 }
 0x2e1   : > { %vm3432_vm9 = vmmov %vm3431_vm5  ;;  %vm3435_vm3 = vcmask 785408  }
 0x2e2   : > { %vm3433_vm10 = vmmov %vm3429_vm6 }
 0x2e3   : > { %vm3436_vm0 = vmmov %vm3430_vm15 }
 0x2e4   : > { %vm3438_vm13 = vmmov %vm3429_vm6 }
 0x2e5   : > { %1280 = vrot.lane.b32.xlu0 %v1198_v44, %s3424_s26  ;;  %1264 = vrot.lane.b32.xlu2 %v1194_v0, %s3425_s27  ;;  %vm3439_vm1 = vmmov %vm3429_vm6 }
 0x2e6   : > { %1222 = vrot.lane.b32.xlu1 %v1186_v51, %s2121_s21  ;;  %vm3441_vm11 = vmmov %vm3436_vm0 }
 0x2e7   : > { %vm3442_vm14 = vmmov %vm3431_vm5 }
 0x2ed   : > { %1266 = vrot.lane.b32.xlu0 %v1195_v60, %s3425_s27  ;;  %1308 = vrot.lane.b32.xlu2 %v1202_v11, %s3426_s28 }
 0x2ee   : > { %1282 = vrot.lane.b32.xlu1 %v1199_v49, %s3424_s26 }
 0x2f5   : > { %1310 = vrot.lane.b32.xlu0 %v1203_v55, %s3426_s28  ;;  %1210 = vrot.lane.b32.xlu2 %v1176_v1, %s2114_s22 }
 0x2f6   : > { %1386 = vrot.lane.b32.xlu1 %v1182_v34, %s2118_s14 }
 0x2fd   : > { %1296 = vrot.lane.b32.xlu0 %v1176_v1, %s2124_s25  ;;  %1256 = vrot.lane.b32.xlu2 %v2868_v42, %s2120_s17 }
 0x2fe   : > { %1298 = vrot.lane.b32.xlu1 %v2868_v42, %s2124_s25 }
 0x305   : > { %1212 = vrot.lane.b32.xlu0 %v2868_v42, %s2114_s22  ;;  %1244 = vrot.lane.b32.xlu2 %v1193_v59, %s2119_s16  ;;  %s1982_s22 = sshll.u32 %s2199_s13, 6 }
 0x306   : > { %1254 = vrot.lane.b32.xlu1 %v1176_v1, %s2120_s17 }
 0x30d   : > { %1226 = vrot.lane.b32.xlu0 %v1188_v23, %s2121_s21  ;;  %1284 = vrot.lane.b32.xlu2 %v1200_v46, %s3424_s26 }
 0x30e   : > { %1242 = vrot.lane.b32.xlu1 %v1192_v13, %s2119_s16 }
 0x315   : > { %1286 = vrot.lane.b32.xlu0 %v1201_v47, %s3424_s26  ;;  %1270 = vrot.lane.b32.xlu2 %v1197_v16, %s3425_s27  ;;  %s323_s26 = sand.u32 1, %s2103_s10  }
 0x316   : > { %1228 = vrot.lane.b32.xlu1 %v1189_v52, %s2121_s21  ;;  %s1796_s25 = scalar_lea.sflag [#allocation3], %s323_s26 }
 0x31d   : > { %1314 = vrot.lane.b32.xlu0 %v1205_v4, %s3426_s28  ;;  %1312 = vrot.lane.b32.xlu2 %v1204_v43, %s3426_s28 }
 0x31e   : > { %1268 = vrot.lane.b32.xlu1 %v1196_v3, %s3425_s27  ;;  %s1877_s27 = sshll.u32 %s323_s26, 6 }
 0x31f   : > { %s3269_s28 = scalar_lea.vmem [#allocation2], %s1877_s27 }
 0x320   : > { %s1808_s21 = sshll.u32 %s3269_s28, 4  ;;  %s1809_s21 = int_to_ptr.vmem [resolvable:$true] %s1808_s21 }
 0x325   : > { %1390 = vrot.lane.b32.xlu0 %v1184_v32, %s2118_s14 }
 0x327   : > { %v2916_v10 = vpop.permute.xlu2 %1294 }
 0x32f   : > { %v1239_v57 = vpop.permute.xlu2 %1238 }
 0x330   : > { %v1246_v61 = vsel %vm3436_vm0, %v2505_v21, %v1239_v57 }
 0x337   : > { %v2918_v18 = vpop.permute.xlu2 %1224 }
 0x33f   : > { %v1207_v5 = vpop.permute.xlu0 %1206  ;;  %v1265_v37 = vpop.permute.xlu2 %1264 }
 0x340   : > { %v1293_v41 = vpop.permute.xlu1 %1292  ;;  %1442 = vrot.lane.b32.xlu1 %v1265_v37, %s2118_s14  ;;  %v1214_v19 = vsel %vm3429_vm6, %v2292_v33, %v1207_v5  ;;  %vm3444_vm6 = vmmov %vm3435_vm3 }
 0x341   : > { %v1300_v28 = vsel %vm3428_vm8, %v1293_v41, %v2916_v10  ;;  %1466 = vrot.lane.b32.xlu2 %v1293_v41, %s2118_s14  ;;  %vm3443_vm8 = vmmov %vm3431_vm5 }
 0x342   : > { %1468 = vrot.lane.b32.xlu0 %v1300_v28, %s2118_s14 }
 0x347   : > { %v2925_v53 = vpop.permute.xlu0 %1250  ;;  %v2927_v14 = vpop.permute.xlu2 %1308 }
 0x348   : > { %v2929_v15 = vpop.permute.xlu1 %1208 }
 0x349   : > { %1430 = vrot.lane.b32.xlu2 %v2925_v53, %s2118_s14  ;;  %v1215_v36 = vsel %vm3433_vm10, %v1207_v5, %v2929_v15  ;;  %vm3448_vm10 = vmmov %vm3437_vm2 }
 0x34a   : > { %v1301_v43 = vsel %vm3448_vm10, %v2916_v10, %v2494_v17 }
 0x34f   : > { %v1241_v25 = vpop.permute.xlu0 %1240  ;;  %v1211_v40 = vpop.permute.xlu2 %1210 }
 0x350   : > { %v1247_v12 = vsel %vm3430_vm15, %v1239_v57, %v1241_v25  ;;  %v2936_v62 = vpop.permute.xlu1 %1252  ;;  %v1216_v27 = vsel %vm3439_vm1, %v2292_v33, %v1211_v40  ;;  %vm3445_vm15 = vmmov %vm3437_vm2  ;;  %vm3453_vm1 = vcmask 769024  }
 0x351   : > { %1394 = vrot.lane.b32.xlu2 %v1214_v19, %s2118_s14  ;;  %1420 = vrot.lane.b32.xlu1 %v1247_v12, %s2118_s14 }
 0x357   : > { %v1281_v56 = vpop.permute.xlu0 %1280  ;;  %v2947_v50 = vpop.permute.xlu2 %1256 }
 0x358   : > { %v1223_v7 = vpop.permute.xlu1 %1222  ;;  %1454 = vrot.lane.b32.xlu0 %v1281_v56, %s2118_s14 }
 0x359   : > { %v1230_v20 = vsel %vm3431_vm5, %v2517_v26, %v1223_v7  ;;  %v1231_v31 = vsel %vm3432_vm9, %v1223_v7, %v2918_v18  ;;  %vm3446_vm5 = vmmov %vm3436_vm0  ;;  %vm3450_vm0 = vnez %v3354_v54 }
 0x35a   : > { %1408 = vrot.lane.b32.xlu2 %v1231_v31, %s2118_s14  ;;  %1406 = vrot.lane.b32.xlu1 %v1230_v20, %s2118_s14  ;;  %vm3447_vm9 = vmmov %vm3434_vm4  ;;  %v1328_v20 = vld [vmem:[%s3326_s6] sm:$0xff] }
 0x35b   : > { %v1686_v31 = vld [vmem:[%s3328_s8] sm:$0xff] }
 0x35f   : > { %v2951_v44 = vpop.permute.xlu0 %1266  ;;  %v1245_v51 = vpop.permute.xlu2 %1244 }
 0x360   : > { %v1272_v0 = vsel %vm3434_vm4, %v1265_v37, %v2951_v44  ;;  %v1283_v63 = vpop.permute.xlu1 %1282  ;;  %1396 = vrot.lane.b32.xlu0 %v1215_v36, %s2118_s14  ;;  %vm3449_vm4 = vmmov %vm3440_vm12  ;;  %v1689_v36 = vld [vmem:[%s3328_s8 + $0x18] sm:$0xff] }
 0x361   : > { %v1288_v48 = vsel %vm3435_vm3, %v1281_v56, %v1283_v63  ;;  %v1258_v3 = vsel %vm3449_vm4, %v2925_v53, %v2936_v62  ;;  %v1289_v32 = vsel %vm3435_vm3, %v1283_v63, %v2528_v35 }
 0x362   : > { %1444 = vrot.lane.b32.xlu2 %v1272_v0, %s2118_s14  ;;  %1456 = vrot.lane.b32.xlu1 %v1288_v48, %s2118_s14  ;;  %v1688_v48 = vld [vmem:[%s3328_s8 + $0x10] sm:$0xff] }
 0x367   : > { %v2961_v8 = vpop.permute.xlu0 %1310  ;;  %v1285_v45 = vpop.permute.xlu2 %1284 }
 0x368   : > { %v2963_v9 = vpop.permute.xlu1 %1386  ;;  %1418 = vrot.lane.b32.xlu0 %v1246_v61, %s2118_s14 }
 0x36f   : > { %v1297_v30 = vpop.permute.xlu0 %1296  ;;  %v1271_v46 = vpop.permute.xlu2 %1270 }
 0x370   : > { %v1299_v60 = vpop.permute.xlu1 %1298  ;;  %1460 = vrot.lane.b32.xlu0 %v1285_v45, %s2118_s14  ;;  %1472 = vrot.lane.b32.xlu1 %v1297_v30, %s2118_s14 }
 0x371   : > { %v1302_v11 = vsel %vm3437_vm2, %v1297_v30, %v1299_v60  ;;  %v1303_v47 = vsel %vm3445_vm15, %v1299_v60, %v2494_v17  ;;  %v1185_v17 = vsel %vm3450_vm0, %v2868_v42, 0  ;;  %vm3451_vm2 = vmmov %vm3447_vm9  ;;  %v1687_v30 = vld [vmem:[%s3328_s8 + $0x8] sm:$0xff] }
 0x372   : > { %1474 = vrot.lane.b32.xlu2 %v1302_v11, %s2118_s14  ;;  %v1275_v10 = vsel %vm3451_vm2, %v1271_v46, %v2530_v38 }
 0x377   : > { %v1213_v22 = vpop.permute.xlu0 %1212 }
 0x378   : > { %v1217_v49 = vsel %vm3438_vm13, %v1211_v40, %v1213_v22  ;;  %v1255_v58 = vpop.permute.xlu1 %1254  ;;  %vm3452_vm13 = vmmov %vm3451_vm2  ;;  %v1329_v40 = vld [vmem:[%s3326_s6 + $0x8] sm:$0xff] }
 0x379   : > { %1436 = vrot.lane.b32.xlu1 %v1255_v58, %s2118_s14  ;;  %v1259_v55 = vsel %vm3440_vm12, %v1255_v58, %v2947_v50  ;;  %vm3454_vm12 = vmmov %vm3453_vm1 }
 0x37a   : > { %1402 = vrot.lane.b32.xlu2 %v1217_v49, %s2118_s14  ;;  %v1316_v28 = vsel %vm3454_vm12, %v2927_v14, %v2961_v8 }
 0x37f   : > { %v1227_v2 = vpop.permute.xlu0 %1226 }
 0x380   : > { %v1243_v1 = vpop.permute.xlu1 %1242  ;;  %v1232_v33 = vsel %vm3442_vm14, %v2517_v26, %v1227_v2  ;;  %v1313_v26 = vpop.permute.xlu2 %1312  ;;  %vm3456_vm14 = vmmov %vm3453_vm1 }
 0x381   : > { %1400 = vrot.lane.b32.xlu1 %v1216_v27, %s2118_s14  ;;  %v1248_v6 = vsel %vm3441_vm11, %v2505_v21, %v1243_v1  ;;  %v1249_v16 = vsel %vm3446_vm5, %v1243_v1, %v1245_v51  ;;  %vm3455_vm11 = vmmov %vm3435_vm3 }
 0x382   : > { %1438 = vrot.lane.b32.xlu2 %v1259_v55, %s2118_s14 }
 0x387   : > { %v1287_v13 = vpop.permute.xlu0 %1286 }
 0x388   : > { %v1229_v34 = vpop.permute.xlu1 %1228  ;;  %v1290_v21 = vsel %vm3444_vm6, %v1285_v45, %v1287_v13  ;;  %vm3458_vm6 = vcmask 138240  }
 0x389   : > { %1422 = vrot.lane.b32.xlu1 %v1241_v25, %s2118_s14  ;;  %v1233_v23 = vsel %vm3443_vm8, %v1227_v2, %v1229_v34  ;;  %vm3457_vm8 = vmmov %vm3453_vm1 }
 0x38a   : > { %1424 = vrot.lane.b32.xlu2 %v1248_v6, %s2118_s14  ;;  %vm3459_vm15 = vmmov %vm3458_vm6 }
 0x38b   : > { %vm3460_vm5 = vmmov %vm3458_vm6 }
 0x38c   : > { %vm3462_vm10 = vmmov %vm3460_vm5 }
 0x38d   : > { %vm3463_vm4 = vmmov %vm3460_vm5 }
 0x38e   : > { %vm3464_vm3 = vmmov %vm3463_vm4 }
 0x38f   : > { %v1315_v37 = vpop.permute.xlu0 %1314 }
 0x390   : > { %v1269_v59 = vpop.permute.xlu1 %1268  ;;  %v1318_v41 = vsel %vm3453_vm1, %v1313_v26, %v1315_v37  ;;  %v1319_v25 = vsel %vm3456_vm14, %v1315_v37, %v2514_v24  ;;  %v1924_v37 = vld [vmem:[%s3325_s5 + $0xc] sm:$0xf0] }
 0x391   : > { %1412 = vrot.lane.b32.xlu1 %v1232_v33, %s2118_s14  ;;  %1448 = vrot.lane.b32.xlu0 %v1269_v59, %s2118_s14  ;;  %v1274_v52 = vsel %vm3447_vm9, %v1269_v59, %v1271_v46  ;;  %vm3461_vm9 = vmmov %vm3460_vm5 }
 0x392   : > { %1414 = vrot.lane.b32.xlu2 %v1233_v23, %s2118_s14 }
 0x397   : > { %v3054_v19 = vpop.permute.xlu0 %1390 }
 0x399   : > { %1462 = vrot.lane.b32.xlu1 %v1290_v21, %s2118_s14  ;;  %1428 = vrot.lane.b32.xlu0 %v1245_v51, %s2118_s14  ;;  %v1330_v51 = vld [vmem:[%s3326_s6 + $0x10] sm:$0xff] }
 0x39a   : > { %1476 = vrot.lane.b32.xlu2 %v1303_v47, %s2118_s14 }
 0x39b   : > { %v3001_v4 = vpop.permute.xlu2 %1466 }
 0x3a1   : > { %1450 = vrot.lane.b32.xlu1 %v1274_v52, %s2118_s14  ;;  %1426 = vrot.lane.b32.xlu0 %v1249_v16, %s2118_s14 }
 0x3a2   : > { %1410 = vrot.lane.b32.xlu2 %v2918_v18, %s2118_s14  ;;  %v1273_v18 = vsel %vm3452_vm13, %v2951_v44, %v2530_v38  ;;  %v1317_v44 = vsel %vm3457_vm8, %v2961_v8, %v2514_v24 }
 0x3a3   : > { %v3014_v57 = vpop.permute.xlu2 %1430 }
 0x3a9   : > { %1470 = vrot.lane.b32.xlu1 %v1301_v43, %s2118_s14  ;;  %1432 = vrot.lane.b32.xlu0 %v1258_v3, %s2118_s14 }
 0x3aa   : > { %1458 = vrot.lane.b32.xlu2 %v1289_v32, %s2118_s14 }
 0x3ab   : > { %v3030_v5 = vpop.permute.xlu2 %1394 }
 0x3b1   : > { %1404 = vrot.lane.b32.xlu1 %v1213_v22, %s2118_s14  ;;  %1416 = vrot.lane.b32.xlu0 %v1229_v34, %s2118_s14 }
 0x3b2   : > { %1392 = vrot.lane.b32.xlu2 %v1185_v17, %s2118_s14  ;;  %v3033_v42 = vpop.permute.xlu1 %1442 }
 0x3b4   : > { %v3042_v38 = vpop.permute.xlu2 %1408 }
 0x3b9   : > { %1452 = vrot.lane.b32.xlu1 %v1275_v10, %s2118_s14  ;;  %1398 = vrot.lane.b32.xlu0 %v2929_v15, %s2118_s14  ;;  %v1291_v15 = vsel %vm3455_vm11, %v1287_v13, %v2528_v35  ;;  %v1183_v35 = vsel %vm3450_vm0, %v2816_v29, 0  ;;  %vm3465_vm0 = vmmov %vm3464_vm3 }
 0x3ba   : > { %1446 = vrot.lane.b32.xlu2 %v1273_v18, %s2118_s14  ;;  %vm3466_vm2 = vmmov %vm3465_vm0  ;;  %v1974_v18 = vld [vmem:[%s3325_s5 + $0x4] sm:$0xf] }
 0x3bb   : > { %vm3467_vm13 = vmmov %vm3465_vm0 }
 0x3bc   : > { %v3056_v12 = vpop.permute.xlu2 %1444  ;;  %vm3468_vm1 = vmmov %vm3465_vm0 }
 0x3bd   : > { %v1510_v52 = vsel %vm3466_vm2, %v3033_v42, %v3056_v12  ;;  %vm3469_vm12 = vmmov %vm3465_vm0 }
 0x3be   : > { %vm3470_vm11 = vmmov %vm3465_vm0 }
 0x3bf   : > { %vm3471_vm14 = vmmov %vm3465_vm0 }
 0x3c0   : > { %vm3472_vm8 = vmmov %vm3465_vm0 }
 0x3c1   : > { %1486 = vrot.lane.b32.xlu1 %v1318_v41, %s2118_s14  ;;  %1484 = vrot.lane.b32.xlu0 %v1313_v26, %s2118_s14  ;;  %vm3480_vm2 = vmmov %vm3465_vm0 }
 0x3c2   : > { %1480 = vrot.lane.b32.xlu2 %v1316_v28, %s2118_s14  ;;  %v3153_v28 = vor.u32 %v1974_v18, %v1924_v37  ;;  %v1980_v18 = vld [vmem:[%s3327_s7] sm:$0xff] }
 0x3c3   : > { %v3044_v53 = vpop.permute.xlu1 %1420 }
 0x3c9   : > { %1478 = vrot.lane.b32.xlu1 %v2927_v14, %s2118_s14  ;;  %1464 = vrot.lane.b32.xlu0 %v1291_v15, %s2118_s14  ;;  %v3069_v14 = vpop.permute.xlu0 %1468 }
 0x3ca   : > { %1488 = vrot.lane.b32.xlu2 %v1319_v25, %s2118_s14  ;;  %v1518_v61 = vsel %vm3459_vm15, %v3001_v4, %v3069_v14  ;;  %vm3474_vm15 = vmmov %vm3465_vm0 }
 0x3cc   : > { %v3061_v56 = vpop.permute.xlu1 %1406  ;;  %v3071_v7 = vpop.permute.xlu2 %1474 }
 0x3cd   : > { %v1498_v42 = vsel %vm3470_vm11, %v3061_v56, %v3042_v38  ;;  %vm3484_vm11 = vmmov %vm3465_vm0 }
 0x3d1   : > { %1434 = vrot.lane.b32.xlu1 %v2936_v62, %s2118_s14  ;;  %1388 = vrot.lane.b32.xlu0 %v1183_v35, %s2118_s14  ;;  %v1455_v29 = vpop.permute.xlu0 %1454  ;;  %v1331_v62 = vld [vmem:[%s3326_s6 + $0x18] sm:$0xff] }
 0x3d2   : > { %1339 = vperm.xlu2 %2048, %v1329_v40  }
 0x3d4   : > { %v3081_v54 = vpop.permute.xlu1 %1456  ;;  %v3092_v0 = vpop.permute.xlu2 %1402 }
 0x3d5   : > { %v1514_v59 = vsel %vm3461_vm9, %v1455_v29, %v3081_v54  ;;  %vm3476_vm9 = vmmov %vm3465_vm0 }
 0x3d6   : > { %v1492_v29 = vsel %vm3476_vm9, %v2532_v39, %v3054_v19  ;;  %vm3490_vm9 = vmmov %vm3465_vm0 }
 0x3d9   : > { %1334 = vperm.xlu1 %2047, %v1328_v20   ;;  %1440 = vrot.lane.b32.xlu0 %v2947_v50, %s2118_s14  ;;  %v3103_v24 = vpop.permute.xlu0 %1396 }
 0x3da   : > { %1692 = vperm.xlu2 %2048, %v1686_v31  }
 0x3dc   : > { %v3108_v8 = vpop.permute.xlu2 %1438 }
 0x3e1   : > { %1349 = vperm.xlu1 %2047, %v1331_v62   ;;  %1482 = vrot.lane.b32.xlu0 %v1317_v44, %s2118_s14  ;;  %v1419_v60 = vpop.permute.xlu0 %1418  ;;  %v1936_v44 = vld [vmem:[%s3325_s5 + $0x24] sm:$0xf0]  ;;  %s1807_s14 = scalar_lea.hbm %s3329_s9, %s1982_s22  ;;  %s2069_s22 = scalar_lea.hbm %s3329_s9, 128 }
 0x3e2   : > { %1707 = vperm.xlu2 %2048, %v1689_v36   ;;  %v1473_v50 = vpop.permute.xlu1 %1472  ;;  %v1502_v16 = vsel %vm3465_vm0, %v1419_v60, %v3044_v53  ;;  %v1922_v36 = vld [vmem:[%s3325_s5] sm:$0xf]  ;;  %s1810_s13 = sshll.u32 %s1807_s14, 4  ;;  %s1811_s13 = int_to_ptr.hbm [resolvable:$true] %s1810_s13 }
 0x3e3   : > { %v1520_v63 = vsel %vm3458_vm6, %v1473_v50, %v3071_v7  ;;  %vm3473_vm6 = vmmov %vm3465_vm0  ;;  %s2063_s29 = sshra.s32 %s1811_s13, 4  ;;  %s2064_s29 = int_to_ptr.hbm [resolvable:$true] %s2063_s29 }
 0x3e4   : > { %1587 = vmatpush.bf16.msra.mxu1 %v1520_v63  ;;  %v1425_v22 = vpop.permute.xlu2 %1424  ;;  %s2065_s23 = scalar_lea.hbm %s2064_s29, 64  ;;  %p2070_p0 = scmp.lt.s32.totalorder %s2064_s29, %s3329_s9 }
 0x3e5   : > { %p2066_p11 = scmp.ne.s32.totalorder %s2064_s29, %s2065_s23  ;;  %p2071_p1 = scmp.lt.s32.totalorder %s2069_s22, %s2065_s23 }
 0x3e7   : > { %p2067_p12 = pnand %p2066_p11, %p2216_p5  ;;  %p2072_p2 = por %p2071_p1, %p2070_p0 }
 0x3e8   : > { %1588 = vmatpush.bf16.msra.mxu1 %v1518_v61 }
 0x3e9   : > { %1702 = vperm.xlu1 %2047, %v1688_v48   ;;  %1344 = vperm.xlu0 %2046, %v1330_v51   ;;  %v1461_v49 = vpop.permute.xlu0 %1460  ;;  %p2068_p13 = pneg %p2067_p12 }
 0x3eb   : > { %v1437_v45 = vpop.permute.xlu1 %1436  ;;  %p2073_p3 = pnand %p2072_p2, %p2068_p13 }
 0x3ec   : > { %v1415_v27 = vpop.permute.xlu2 %1414  ;;  %v1508_v10 = vsel %vm3469_vm12, %v1437_v45, %v3108_v8  ;;  %vm3483_vm12 = vmmov %vm3465_vm0 }
 0x3f1   : > { %1697 = vperm.xlu0 %2046, %v1687_v30  }
 0x3f3   : > { %v1401_v11 = vpop.permute.xlu1 %1400 }
 0x3f4   : > { %v3113_v34 = vpop.permute.xlu2 %1476  ;;  %v1496_v25 = vsel %vm3472_vm8, %v1401_v11, %v3092_v0  ;;  %v1976_v11 = vld [vmem:[%s3325_s5 + $0x10] sm:$0xf0]  ;;  %vm3486_vm8 = vmmov %vm3465_vm0 }
 0x3f5   : > { %v1521_v61 = vsel %vm3465_vm0, %v3071_v7, %v3113_v34  ;;  %v1930_v7 = vld [vmem:[%s3325_s5 + $0x8] sm:$0xf]  ;;  %v1934_v34 = vld [vmem:[%s3325_s5 + $0x18] sm:$0xf] }
 0x3fb   : > { %v1423_v58 = vpop.permute.xlu1 %1422 }
 0x3fc   : > { %v1411_v23 = vpop.permute.xlu2 %1410  ;;  %v1503_v4 = vsel %vm3467_vm13, %v3044_v53, %v1423_v58  ;;  %vm3481_vm13 = vmmov %vm3465_vm0  ;;  %v1721_v58 = vld.sshfl [vmem:[#allocation1] sm:$0xff pattern:$0x73625140] }
 0x403   : > { %v1449_v1 = vpop.permute.xlu0 %1448  ;;  %v1413_v55 = vpop.permute.xlu1 %1412 }
 0x404   : > { %v3136_v32 = vpop.permute.xlu2 %1458  ;;  %v1500_v17 = vsel %vm3468_vm1, %v1413_v55, %v1415_v27  ;;  %vm3482_vm1 = vmmov %vm3465_vm0 }
 0x40b   : > { %v1429_v6 = vpop.permute.xlu0 %1428  ;;  %v3115_v2 = vpop.permute.xlu1 %1462 }
 0x40c   : > { %v1516_v33 = vsel %vm3460_vm5, %v1461_v49, %v3115_v2  ;;  %v1393_v56 = vpop.permute.xlu2 %1392  ;;  %vm3475_vm5 = vmmov %vm3465_vm0 }
 0x40d   : > { %1589 = vmatpush.bf16.msra.mxu1 %v1516_v33  ;;  %v1499_v35 = vsel %vm3475_vm5, %v3042_v38, %v1411_v23  ;;  %v1977_v38 = vld [vmem:[%s3325_s5 + $0x1c] sm:$0xf]  ;;  %vm3489_vm5 = vmmov %vm3465_vm0 }
 0x40e   : > { %v3186_v51 = vor.u32 %v1977_v38, %v1936_v44 }
 0x411   : > { %1590 = vmatpush.bf16.msra.mxu1 %v1514_v59  ;;  %v1722_v59 = vld.sshfl [vmem:[#allocation1 + $0x8] sm:$0xff pattern:$0x73625140] }
 0x413   : > { %v1427_v46 = vpop.permute.xlu0 %1426  ;;  %v3121_v13 = vpop.permute.xlu1 %1450 }
 0x414   : > { %v1504_v21 = vsel %vm3462_vm10, %v1425_v22, %v1427_v46  ;;  %v1505_v47 = vsel %vm3463_vm4, %v1427_v46, %v1429_v6  ;;  %v1512_v26 = vsel %vm3464_vm3, %v1449_v1, %v3121_v13  ;;  %vm3477_vm10 = vmmov %vm3465_vm0  ;;  %v1931_v1 = vor.u32 %v1976_v11, %v1930_v7  ;;  %v1978_v6 = vld [vmem:[%s3325_s5 + $0x20] sm:$0xf0] }
 0x415   : > { %1568 = vmatpush.bf16.msra.mxu0 %v1504_v21  ;;  %1591 = vmatpush.bf16.msra.mxu1 %v1512_v26  ;;  %vm3478_vm4 = vmmov %vm3465_vm0  ;;  %v1935_v33 = vor.u32 %v1978_v6, %v1934_v34 }
 0x416   : > { %1983 = vmatpush.bf16.msra.mxu3 %v1505_v47  ;;  %v1490_v50 = vsel %vm3478_vm4, %v2532_v39, %v2963_v9  ;;  %vm3479_vm3 = vmmov %vm3465_vm0  ;;  %v1493_v39 = vsel %vm3481_vm13, %v3054_v19, %v1393_v56 }
 0x417   : > { %vm3492_vm4 = vmmov %vm3465_vm0 }
 0x419   : > { %1569 = vmatpush.bf16.msra.mxu0 %v1502_v16  ;;  %1592 = vmatpush.bf16.msra.mxu1 %v1510_v52  ;;  %v1979_v52 = vld [vmem:[%s3325_s5 + $0x28] sm:$0xf0] }
 0x41a   : > { %1984 = vmatpush.bf16.msra.mxu3 %v1503_v4 }
 0x41b   : > { %v3134_v43 = vpop.permute.xlu0 %1432  ;;  %v1471_v3 = vpop.permute.xlu1 %1470 }
 0x41c   : > { %v1506_v41 = vsel %vm3471_vm14, %v3014_v57, %v3134_v43  ;;  %v1494_v57 = vsel %vm3474_vm15, %v3030_v5, %v3103_v24  ;;  %v1975_v5 = vld [vmem:[%s3325_s5 + $0x8] sm:$0xf0]  ;;  %vm3485_vm14 = vcmask 1041408  }
 0x41d   : > { %1570 = vmatpush.bf16.msra.mxu0 %v1500_v17  ;;  %1593 = vmatpush.bf16.msra.mxu1 %v1508_v10  ;;  %v1923_v48 = vor.u32 %v1975_v5, %v1922_v36  ;;  %v1729_v55 = vsel %vm3485_vm14, %v1721_v58, 0  ;;  %vm3488_vm15 = vmmov %vm3485_vm14 }
 0x421   : > { %1571 = vmatpush.bf16.msra.mxu0 %v1498_v42  ;;  %1594 = vmatpush.bf16.msra.mxu1 %v1506_v41 }
 0x423   : > { %v1417_v53 = vpop.permute.xlu0 %1416  ;;  %v1405_v15 = vpop.permute.xlu1 %1404 }
 0x424   : > { %v1501_v40 = vsel %vm3473_vm6, %v1415_v27, %v1417_v53  ;;  %1595 = vmatmul.bf16.vlgmr.msra.gmra.mxu1 %v3153_v28  ;;  %v1497_v62 = vsel %vm3477_vm10, %v3092_v0, %v1405_v15  ;;  %v1447_v0 = vpop.permute.xlu2 %1446  ;;  %vm3487_vm6 = vmmov %vm3465_vm0 }
 0x425   : > { %1625 = vmatpush.bf16.msrb.mxu1 %v1505_v47  ;;  %1572 = vmatpush.bf16.msra.mxu0 %v1496_v25  ;;  %v1731_v47 = vsel %vm3488_vm15, %v1722_v59, 0  ;;  %vm3491_vm10 = vmmov %vm3465_vm0 }
 0x426   : > { %1985 = vmatpush.bf16.msra.mxu3 %v1501_v40 }
 0x429   : > { %1626 = vmatpush.bf16.msrb.mxu1 %v1503_v4  ;;  %1573 = vmatpush.bf16.msra.mxu0 %v1494_v57 }
 0x42a   : > { %1986 = vmatpush.bf16.msra.mxu3 %v1499_v35 }
 0x42b   : > { %v1399_v20 = vpop.permute.xlu0 %1398  ;;  %v1453_v31 = vpop.permute.xlu1 %1452 }
 0x42c   : > { %v1495_v63 = vsel %vm3479_vm3, %v3103_v24, %v1399_v20  ;;  %v1519_v24 = vsel %vm3482_vm1, %v3069_v14, %v1471_v3  ;;  %v1481_v22 = vpop.permute.xlu2 %1480  ;;  %v1513_v16 = vsel %vm3490_vm9, %v3121_v13, %v1453_v31  ;;  %vm3493_vm3 = vmmov %vm3465_vm0 }
 0x42d   : > { %1627 = vmatpush.bf16.msrb.mxu1 %v1501_v40  ;;  %1574 = vmatpush.bf16.msra.mxu0 %v1492_v29 }
 0x42e   : > { %1987 = vmatpush.bf16.msra.mxu3 %v1497_v62 }
 0x431   : > { %1628 = vmatpush.bf16.msrb.mxu1 %v1499_v35  ;;  %1575 = vmatpush.bf16.msra.mxu0 %v1490_v50 }
 0x432   : > { %1988 = vmatpush.bf16.msra.mxu3 %v1495_v63 }
 0x433   : > { %v1485_v45 = vpop.permute.xlu0 %1484  ;;  %v1487_v30 = vpop.permute.xlu1 %1486 }
 0x434   : > { %v1524_v60 = vsel %vm3480_vm2, %v1485_v45, %v1487_v30  ;;  %1576 = vmatmul.bf16.vlgmr.msra.gmra.mxu0 %v1923_v48  ;;  %1600 = vmatmul.bf16.gmra.mxu1 %v3186_v51  ;;  %v1489_v46 = vpop.permute.xlu2 %1488  ;;  %vm3494_vm2 = vcmask 31744  }
 0x435   : > { %1629 = vmatpush.bf16.msrb.mxu1 %v1497_v62  ;;  %1644 = vmatpush.bf16.msrb.mxu0 %v1521_v61  ;;  %v1525_v26 = vsel %vm3489_vm5, %v1487_v30, %v1489_v46  ;;  %vm3495_vm13 = vmmov %vm3494_vm2 }
 0x436   : > { %1612 = vmatpush.bf16.msra.mxu2 %v1524_v60  ;;  %1989 = vmatpush.bf16.msra.mxu3 %v1493_v39  ;;  %vm3496_vm1 = vmmov %vm3494_vm2 }
 0x439   : > { %1630 = vmatpush.bf16.msrb.mxu1 %v1495_v63  ;;  %1645 = vmatpush.bf16.msrb.mxu0 %v1519_v24 }
 0x43b   : > { %v1465_v19 = vpop.permute.xlu0 %1464  ;;  %v1479_v49 = vpop.permute.xlu1 %1478 }
 0x43c   : > { %v1522_v27 = vsel %vm3483_vm12, %v1479_v49, %v1481_v22  ;;  %v1517_v14 = vsel %vm3484_vm11, %v3115_v2, %v1465_v19  ;;  %v1515_v2 = vsel %vm3486_vm8, %v3081_v54, %v3136_v32  ;;  %v1511_v54 = vsel %vm3491_vm10, %v3056_v12, %v1447_v0  ;;  %vm3497_vm12 = vmmov %vm3496_vm1  ;;  %v3263_v29 = vpop.permute.xlu2 %1339 }
 0x43d   : > { %1631 = vmatpush.bf16.msrb.mxu1 %v1493_v39  ;;  %1613 = vmatpush.bf16.msra.mxu2 %v1522_v27 }
 0x43e   : > { %1646 = vmatpush.bf16.msrb.mxu0 %v1517_v14 }
 0x440   : > { %1944 = vmatmul.msk.bf16.vlgmr.msra.gmra.mxu2 %vm1029_vm7, %v1931_v1 }
 0x441   : > { %1991 = vmatpush.bf16.msrb.mxu2 %v1729_v55 }
 0x442   : > { %1647 = vmatpush.bf16.msrb.mxu0 %v1515_v2 }
 0x443   : > { %v1389_v23 = vpop.permute.xlu0 %1388  ;;  %v1435_v32 = vpop.permute.xlu1 %1434 }
 0x444   : > { %1581 = vmatmul.bf16.gmra.mxu0 %v1935_v33  ;;  %v1491_v21 = vsel %vm3487_vm6, %v2963_v9, %v1389_v23  ;;  %v1942_v9 = vld [vmem:[%s3325_s5 + $0x20] sm:$0xf]  ;;  %v1507_v12 = vsel %vm3493_vm3, %v3134_v43, %v1435_v32  ;;  %v1693_v63 = vpop.permute.xlu2 %1692 }
 0x445   : > { %1632 = vmatpush.bf16.msrb.mxu1 %v1491_v21  ;;  %1990 = vmatpush.bf16.msra.mxu3 %v1491_v21  ;;  %v1943_v3 = vor.u32 %v1979_v52, %v1942_v9 }
 0x446   : > { %1648 = vmatpush.bf16.msrb.mxu0 %v1513_v16 }
 0x448   : > { %1633 = vmatmul.bf16.vlgmr.msrb.gmra.mxu1 %v1923_v48  ;;  %1638 = vmatmul.bf16.vlgmr.msra.gmra.mxu3 %v1935_v33 }
 0x449   : > { %1669 = vmatpush.bf16.msra.mxu1 %v1525_v26  ;;  %1759 = vmatpush.bf16.msrb.mxu3 %v1731_v47 }
 0x44a   : > { %1649 = vmatpush.bf16.msrb.mxu0 %v1511_v54 }
 0x44b   : > { %v1441_v4 = vpop.permute.xlu0 %1440  ;;  %v1335_v20 = vpop.permute.xlu1 %1334 }
 0x44c   : > { %v1509_v13 = vsel %vm3492_vm4, %v3108_v8, %v1441_v4  ;;  %v1981_v8 = vld [vmem:[%s3327_s7 + $0x8] sm:$0xff]  ;;  %v1708_v54 = vpop.permute.xlu2 %1707 }
 0x44e   : > { %1650 = vmatpush.bf16.msrb.mxu0 %v1509_v13 }
 0x450   : > { %1945 = vmatmul.msk.bf16.gmra.mxu2 %vm1029_vm7, %v1943_v3 }
 0x452   : > { %1651 = vmatpush.bf16.msrb.mxu0 %v1507_v12 }
 0x453   : > { %v1483_v17 = vpop.permute.xlu0 %1482  ;;  %v1350_v44 = vpop.permute.xlu1 %1349 }
 0x454   : > { %v1523_v10 = vsel %vm3465_vm0, %v1481_v22, %v1483_v17 }
 0x455   : > { %1652 = vmatmul.bf16.vlgmr.msrb.gmra.mxu0 %v3153_v28  ;;  %1670 = vmatpush.bf16.msra.mxu1 %v1523_v10 }
 0x456   : > { %1740 = vmatpush.bf16.msra.mxu0 %v1729_v55 }
 0x458   : > { %1946 = vmatmul.msk.bf16.vlgmr.msra.gmra.mxu1 %vm1029_vm7, %v1931_v1  ;;  %1958 = vmatmul.msk.bf16.vlgmr.msrb.gmra.mxu3 %vm3494_vm2, %v1980_v18 }
 0x45b   : > { %v1345_v0 = vpop.permute.xlu0 %1344  ;;  %v1703_v19 = vpop.permute.xlu1 %1702 }
 0x460   : > { %1957 = vmatmul.msk.bf16.vlgmr.msrb.gmra.mxu2 %vm3495_vm13, %v1981_v8 }
 0x463   : > { %v1698_v49 = vpop.permute.xlu0 %1697 }
 0x465   : > { %1657 = vmatmul.bf16.gmra.mxu0 %v3186_v51 }
 0x468   : > { %1947 = vmatmul.msk.bf16.gmra.mxu1 %vm1029_vm7, %v1943_v3  ;;  %1959 = vmatmul.msk.bf16.gmra.mxu3 %vm3496_vm1, %v1981_v8 }
 0x475   : > { %1956 = vmatmul.msk.bf16.vlgmr.msra.gmra.mxu0 %vm3497_vm12, %v1980_v18 }
 0x4a1   : > { %v3251_v43 = vpop.f32.mrf.mxu1 }
 0x4a9   : > { %v3253_v37 = vpop.f32.mrf.mxu1 }
 0x4b1   : > { %v3255_v42 = vpop.f32.mrf.mxu0  ;;  %v1601_v41 = vpop.f32.mrf.mxu1 }
 0x4b2   : > { %v1578_v18 = vadd.f32 %v3255_v42, %v1335_v20 }
 0x4b9   : > { %v3257_v28 = vpop.f32.mrf.mxu0  ;;  %v1603_v53 = vpop.f32.mrf.mxu1 }
 0x4c1   : > { %v1582_v15 = vpop.f32.mrf.mxu0 }
 0x4c2   : > { %v1583_v24 = vadd.f32 %v1582_v15, %v1345_v0 }
 0x4c3   : > { %v3259_v25 = vpop.f32.mrf.mxu2 }
 0x4c4   : > { %v1602_v58 = vadd.f32 %v1601_v41, %v1583_v24 }
 0x4c5   : > { %v1634_v40 = vpop.f32.mrf.mxu1 }
 0x4c6   : > { %v1635_v50 = vadd.f32 %v1634_v40, %v1335_v20 }
 0x4c9   : > { %v1584_v56 = vpop.f32.mrf.mxu0 }
 0x4ca   : > { %v1585_v59 = vadd.f32 %v1584_v56, %v1350_v44  ;;  %v1597_v56 = vadd.f32 %v3251_v43, %v1578_v18 }
 0x4cb   : > { %v3261_v57 = vpop.f32.mrf.mxu2  ;;  %v1639_v35 = vpop.f32.mrf.mxu3 }
 0x4cc   : > { %v1640_v47 = vadd.f32 %v1639_v35, %v1345_v0  ;;  %v1604_v9 = vadd.f32 %v1603_v53, %v1585_v59 }
 0x4cd   : > { %v1636_v31 = vpop.f32.mrf.mxu1 }
 0x4ce   : > { %v1637_v11 = vadd.f32 %v1636_v31, %v3263_v29 }
 0x4d2   : > { %v1653_v62 = vpop.f32.mrf.mxu0 }
 0x4d3   : > { %v1620_v36 = vpop.f32.mrf.mxu2  ;;  %v1641_v5 = vpop.f32.mrf.mxu3  ;;  %v1654_v48 = vadd.f32 %v1653_v62, %v1635_v50 }
 0x4d4   : > { %v1621_v34 = vadd.f32 %v1620_v36, %v1602_v58  ;;  %v1642_v15 = vadd.f32 %v1641_v5, %v1350_v44  ;;  %v1616_v36 = vadd.f32 %v3259_v25, %v1597_v56  ;;  %v1580_v5 = vadd.f32 %v3257_v28, %v3263_v29 }
 0x4d5   : > { %v1672_v38 = vpop.f32.mrf.mxu1 }
 0x4d6   : > { %v1673_v30 = vadd.f32 %v1672_v38, %v1654_v48  ;;  %v1599_v25 = vadd.f32 %v3253_v37, %v1580_v5 }
 0x4da   : > { %v1655_v51 = vpop.f32.mrf.mxu0 }
 0x4db   : > { %v1622_v61 = vpop.f32.mrf.mxu2  ;;  %v1761_v45 = vpop.f32.mrf.mxu3  ;;  %v1656_v27 = vadd.f32 %v1655_v51, %v1637_v11  ;;  %v1618_v51 = vadd.f32 %v3261_v57, %v1599_v25 }
 0x4dc   : > { %v1762_v60 = vadd.f32 %v1761_v45, %v1693_v63  ;;  %v1623_v32 = vadd.f32 %v1622_v61, %v1604_v9 }
 0x4dd   : > { %v1674_v39 = vpop.f32.mrf.mxu1 }
 0x4de   : > { %v1772_v7 = vadd.f32 %v1762_v60, %v1673_v30  ;;  %v1675_v6 = vadd.f32 %v1674_v39, %v1656_v27 }
 0x4e0   : > { %v1780_v22 = vmax.f32 %v1772_v7, 0.0 }
 0x4e2   : > { %1788 = vst [vmem:[%s3269_s28 + $0x8] sm:$0xff] %v1780_v22  ;;  %v1658_v14 = vpop.f32.mrf.mxu0 }
 0x4e3   : > { %v1747_v1 = vpop.f32.mrf.mxu2  ;;  %v1763_v55 = vpop.f32.mrf.mxu3  ;;  %v1659_v52 = vadd.f32 %v1658_v14, %v1640_v47 }
 0x4e4   : > { %v1748_v2 = vadd.f32 %v1747_v1, %v1703_v19  ;;  %v1764_v33 = vadd.f32 %v1763_v55, %v1698_v49 }
 0x4e5   : > { %v1677_v21 = vpop.f32.mrf.mxu1 }
 0x4e6   : > { %v1775_v23 = vadd.f32 %v1748_v2, %v1621_v34  ;;  %v1774_v46 = vadd.f32 %v1764_v33, %v1675_v6  ;;  %v1678_v12 = vadd.f32 %v1677_v21, %v1659_v52 }
 0x4e8   : > { %v1783_v26 = vmax.f32 %v1775_v23, 0.0  ;;  %v1782_v16 = vmax.f32 %v1774_v46, 0.0 }
 0x4ea   : > { %1791 = vst [vmem:[%s3269_s28 + $0x20] sm:$0xff] %v1783_v26  ;;  %v1660_v4 = vpop.f32.mrf.mxu0 }
 0x4eb   : > { %1790 = vst [vmem:[%s3269_s28 + $0x18] sm:$0xff] %v1782_v16  ;;  %v1749_v13 = vpop.f32.mrf.mxu2  ;;  %v1766_v3 = vpop.f32.mrf.mxu3  ;;  %v1661_v31 = vadd.f32 %v1660_v4, %v1642_v15 }
 0x4ec   : > { %v1750_v17 = vadd.f32 %v1749_v13, %v1708_v54  ;;  %v1767_v10 = vadd.f32 %v1766_v3, %v1703_v19 }
 0x4ed   : > { %v1679_v35 = vpop.f32.mrf.mxu1 }
 0x4ee   : > { %v1777_v8 = vadd.f32 %v1750_v17, %v1623_v32  ;;  %v1776_v41 = vadd.f32 %v1767_v10, %v1678_v12  ;;  %v1680_v42 = vadd.f32 %v1679_v35, %v1661_v31 }
 0x4f0   : > { %v1785_v40 = vmax.f32 %v1777_v8, 0.0  ;;  %v1784_v53 = vmax.f32 %v1776_v41, 0.0 }
 0x4f2   : > { %1793 = vst [vmem:[%s3269_s28 + $0x30] sm:$0xff] %v1785_v40  ;;  %v1742_v62 = vpop.f32.mrf.mxu0 }
 0x4f3   : > { %1792 = vst [vmem:[%s3269_s28 + $0x28] sm:$0xff] %v1784_v53  ;;  %v1743_v38 = vadd.f32 %v1742_v62, %v1693_v63  ;;  %v1768_v0 = vpop.f32.mrf.mxu3 }
 0x4f4   : > { %v1769_v20 = vadd.f32 %v1768_v0, %v1708_v54 }
 0x4f5   : > { %v1771_v44 = vadd.f32 %v1743_v38, %v1616_v36 }
 0x4f6   : > { %v1778_v43 = vadd.f32 %v1769_v20, %v1680_v42 }
 0x4f7   : > { %v1779_v50 = vmax.f32 %v1771_v44, 0.0 }
 0x4f8   : > { %v1786_v48 = vmax.f32 %v1778_v43, 0.0 }
 0x4f9   : > { %1787 = vst [vmem:[%s3269_s28] sm:$0xff] %v1779_v50 }
 0x4fa   : > { %1794 = vst [vmem:[%s3269_s28 + $0x38] sm:$0xff] %v1786_v48  ;;  %v1744_v63 = vpop.f32.mrf.mxu0 }
 0x4fb   : > { %v1745_v28 = vadd.f32 %v1744_v63, %v1698_v49 }
 0x4fd   : > { %v1773_v29 = vadd.f32 %v1745_v28, %v1618_v51 }
 0x4ff   : > { %v1781_v61 = vmax.f32 %v1773_v29, 0.0 }
 0x501   : > { %1789 = vst [vmem:[%s3269_s28 + $0x10] sm:$0xff] %v1781_v61 }
 0x502   : > { %2076 = shalt.err (!%p2073_p3)
}
 0x503   : > { %s2126_s26 = smov 256   ;;  %s2127_s28 = smov 16  }
 0x504   : > { %1992 = dma.vmem_to_hbm [thread:$0]  (%p2216_p5), %s1809_s21, 1024, %s1811_s13, %s1796_s25, %s2126_s26, %s2126_s26, %s2127_s28  }
 0x505 PF: > { %p1998_p4 = scmp.ge.s32.totalorder %s2111_s12, 2  ;;  %s1825_s14 = sand.u32 1, %s2099_s30  }
 0x506   : > { %s1826_s24 = scalar_lea.sflag [#allocation3], %s1825_s14 }
 0x507   : > { %p1995_p7 = pnand %p1998_p4, %p2220_p6 }
 0x509   : > { %p1996_p8 = pneg %p1995_p7 }
 0x50b   : > { %2094 = dma.done.wait (%p1996_p8), %s1826_s24, 1024  }
 0x50c   : > { %2096 = vsyncadd (%p1996_p8), %s1826_s24, 4294966272  ;;  %p19_p9 = scmp.ge.s32.totalorder %s2203_s15, 4   ;;  %s3498_s30 = smov %s2103_s10 }
 0x50d   : > { %s3499_s10 = smov %s2107_s11  ;;  %s3500_s11 = smov %s2214_s18 }
 0x50e   : > { %s3501_s12 = smov %s2203_s15  ;;  %21 = sbr.rel (!%p19_p9) target bundleno = 3 (0x3), region = 91 }
 0x513   :  { %1832 = vsyncpa [#allocation3], 1 }
 0x514   :  { %1834 = vsyncpa [#allocation3 + $0x1], 1 }

</bundles_post_ra>
